<compile_context>
chip_gen: v7x
topology: tpu7x:2x2x1
jax: 0.10.0
libtpu: 0.0.40
codegen_flags: <defaults>
</compile_context>

<pallas_src>
import functools
import math

import jax
import jax.numpy as jnp
from jax.experimental import pallas as pl
from jax.experimental.pallas import tpu as pltpu


def _graph_learner_kernel(ctxq_ref, ctxk_ref, e_ref, s_ref, out_ref, *,
                          epsilon, num_pers, matmul_dtype):
    """One (batch, query-row-tile) grid step.

    ctxq_ref: (1, TM, D)   query-side node features (rows padded to mult. of 8)
    ctxk_ref: (1, Nl, D)   key-side node features  (rows padded to mult. of 128)
    e_ref:    (D, P*D)     expand+weight matrix  E[d, p*D+d'] = w[p,d] * (d==d')
    s_ref:    (P*D, P)     block-diagonal selector S[k, p] = (k // D == p)
    out_ref:  (1, TM, Nl)  epsilon-masked attention tile
    """
    inv_sqrt_p = 1.0 / math.sqrt(num_pers)   # folds mean-over-P into G @ G^T
    emb = e_ref[...]                          # (D, K)
    sel = s_ref[...]                          # (K, P)

    def build_g(ctx):                         # ctx: (rows, D) float32
        # cf[n, p*D+d] = ctx[n, d] * w[p, d] — one MXU pass; each output element
        # has exactly one nonzero term, so this is exact in f32.
        cf = jax.lax.dot_general(ctx, emb, (((1,), (0,)), ((), ())),
                                 preferred_element_type=jnp.float32)      # (rows, K)
        # Per-perspective squared norms via the selector (tiny MXU matmul).
        sq = jax.lax.dot_general(cf * cf, sel, (((1,), (0,)), ((), ())),
                                 preferred_element_type=jnp.float32)      # (rows, P)
        # F.normalize clamp: 1/max(||x||, 1e-12) == rsqrt(max(||x||^2, 1e-24)).
        # Padded (all-zero) rows give cf == 0, so 0 * huge_scale == 0 exactly —
        # padded rows stay exact zeros in G (relied upon for correctness).
        scale = jax.lax.rsqrt(jnp.maximum(sq, 1e-24)) * inv_sqrt_p        # (rows, P)
        # Expand (rows, P) -> (rows, K) with S^T (tiny MXU matmul, no relayout).
        scale_full = jax.lax.dot_general(scale, sel, (((1,), (1,)), ((), ())),
                                         preferred_element_type=jnp.float32)
        return (cf * scale_full).astype(matmul_dtype)                     # (rows, K)

    gq = build_g(ctxq_ref[0])                 # (TM, K)
    gk = build_g(ctxk_ref[0])                 # (Nl, K)

    # Single Gram matmul (mean over perspectives already folded into G), f32 acc.
    att = jax.lax.dot_general(gq, gk, (((1,), (1,)), ((), ())),
                              preferred_element_type=jnp.float32)         # (TM, Nl)

    # Epsilon neighbourhood with markoff_value = 0.  (Single vselect; differs from
    # PyTorch's att * mask only when att is NaN/Inf.)
    out_ref[0] = jnp.where(att > epsilon, att, 0.0)


def _ceil_to(x, m):
    return max(m, ((x + m - 1) // m) * m)


def _pad_rows(x, rows):
    b, n, d = x.shape
    if rows == n:
        return x
    return jnp.pad(x, ((0, 0), (0, rows - n), (0, 0)))


def _vmem_limit_bytes(tm, nl, d, k):
    """Raise the scoped VMEM limit only when the per-step footprint needs it."""
    blocks = 2 * 4 * (tm * d + nl * d + tm * nl) + 4 * (d * k + k * 16)
    temps = (nl + tm) * k * (4 + 4 + 2)        # cf (f32) + scale_full (f32) + G (bf16)
    need = blocks + temps
    default = 32 * 1024 * 1024
    if need <= default:
        return None                            # keep compiler default
    return min(int(need * 1.25), 100 * 1024 * 1024)


def graph_learner_forward(context, weight_tensor, epsilon=0.0, *,
                          matmul_dtype=jnp.bfloat16, query_tile=256,
                          trim_output=True):
    """context: (B, N, D) float32; weight_tensor: (P, D) float32 -> (B, N, N).

    For large N, pass trim_output=False and consume the padded (B, Mq, Nl) result
    downstream — the post-kernel slice is an extra full HBM read+write of the
    O(B*N^2) output.
    """
    context = context.astype(jnp.float32)
    weight_tensor = weight_tensor.astype(jnp.float32)
    B, N, D = context.shape
    P, Dw = weight_tensor.shape
    assert D == Dw
    K = P * D

    eps_val = float(epsilon) if epsilon is not None else float("-inf")

    # Row (M/sublane) padding to a multiple of 8; key/lane padding to >=128 mult.
    SUB, LANE = 8, 128
    Nm = _ceil_to(N, SUB)
    Nl = _ceil_to(N, LANE)
    assert query_tile % SUB == 0
    TM = Nm if Nm <= query_tile else query_tile
    Ni = -(-Nm // TM)
    Mq = TM * Ni

    ctx_q = _pad_rows(context, Mq)            # (B, Mq, D)  query-side rows
    ctx_k = _pad_rows(context, Nl)            # (B, Nl, D)  key-side rows

    # Tiny constant operands built once in the wrapper (DMA'd once: constant
    # index_map), so the kernel does no iota/relayout work at all.
    w_flat = weight_tensor.reshape(1, K)                              # [p*D + d] = w[p, d]
    k_ids = jnp.arange(K, dtype=jnp.int32)
    d_ids = jnp.arange(D, dtype=jnp.int32)
    p_ids = jnp.arange(P, dtype=jnp.int32)
    emb = jnp.where((k_ids[None, :] % D) == d_ids[:, None],
                    w_flat, 0.0).astype(jnp.float32)                  # (D, K)
    sel = ((k_ids[:, None] // D) == p_ids[None, :]).astype(jnp.float32)  # (K, P)

    kernel = functools.partial(_graph_learner_kernel, epsilon=eps_val,
                               num_pers=P, matmul_dtype=matmul_dtype)

    out = pl.pallas_call(
        kernel,
        out_shape=jax.ShapeDtypeStruct((B, Mq, Nl), jnp.float32),
        grid_spec=pltpu.PrefetchScalarGridSpec(
            num_scalar_prefetch=0,
            grid=(B, Ni),
            in_specs=[
                pl.BlockSpec((1, TM, D), lambda b, i: (b, i, 0)),   # query rows
                pl.BlockSpec((1, Nl, D), lambda b, i: (b, 0, 0)),   # key rows (no re-DMA over i)
                pl.BlockSpec((D, K), lambda b, i: (0, 0)),          # expand+weight matrix
                pl.BlockSpec((K, P), lambda b, i: (0, 0)),          # block-diag selector
            ],
            out_specs=pl.BlockSpec((1, TM, Nl), lambda b, i: (b, i, 0)),
        ),
        compiler_params=pltpu.CompilerParams(
            # Both axes independent: batch and query-row tiles split across
            # v7x's two TensorCores even when B == 1.
            dimension_semantics=("parallel", "parallel"),
            vmem_limit_bytes=_vmem_limit_bytes(TM, Nl, D, K),
        ),
    )(ctx_q, ctx_k, emb, sel)

    if trim_output and (Mq != N or Nl != N):
        out = out[:, :N, :N]
    return out


if __name__ == "__main__":
    # Small shapes consistent with the module: batch=2, nodes=8, input_size=32, num_pers=16.
    B, N, D, P = 2, 8, 32, 16
    epsilon = 0.0

    key = jax.random.PRNGKey(0)
    kc, kw = jax.random.split(key)

    context = jax.random.normal(kc, (B, N, D), dtype=jnp.float32)

    # Deterministic xavier_uniform_-style init for weight_tensor (fan_in=D, fan_out=P).
    bound = math.sqrt(6.0 / (D + P))
    weight_tensor = jax.random.uniform(kw, (P, D), dtype=jnp.float32,
                                       minval=-bound, maxval=bound)

    # Pure-JAX reference (mirrors the PyTorch forward).
    cf = context[None, :, :, :] * weight_tensor[:, None, None, :]      # (P, B, N, D)
    nrm = jnp.sqrt(jnp.sum(cf * cf, axis=-1, keepdims=True))
    cfn = cf / jnp.maximum(nrm, 1e-12)
    ref = jnp.mean(jnp.einsum('pbnd,pbmd->pbnm', cfn, cfn), axis=0)    # (B, N, N)
    ref = ref * (ref > epsilon).astype(ref.dtype)

    # Default (bf16 Gram matmul, f32 accumulation) — fast path.
    out_bf16 = graph_learner_forward(context, weight_tensor, epsilon=epsilon)
    out_bf16 = jax.block_until_ready(out_bf16)
    assert out_bf16.shape == (B, N, N)
    assert jnp.allclose(out_bf16, ref, atol=1e-2, rtol=1e-2), \
        "Pallas kernel (bf16 matmul) mismatch vs reference"

    # Full-f32 mode for a tight numerical check.
    out_f32 = graph_learner_forward(context, weight_tensor, epsilon=epsilon,
                                    matmul_dtype=jnp.float32)
    out_f32 = jax.block_until_ready(out_f32)
    assert jnp.allclose(out_f32, ref, atol=1e-5), \
        "Pallas kernel (f32 matmul) mismatch vs reference"

    print("KERNEL_OK")
</pallas_src>

<mosaic_0001>
module attributes {stable_mosaic.version = 11 : i64} {
  func.func @_graph_learner_kernel(%arg0: i32, %arg1: i32, %arg2: memref<1x8x32xf32, #tpu.memory_space<vmem>>, %arg3: memref<1x128x32xf32, #tpu.memory_space<vmem>>, %arg4: memref<32x512xf32, #tpu.memory_space<vmem>>, %arg5: memref<512x16xf32, #tpu.memory_space<vmem>>, %arg6: memref<1x8x128xf32, #tpu.memory_space<vmem>>) attributes {dimension_semantics = [#tpu.dimension_semantics<parallel>, #tpu.dimension_semantics<parallel>], iteration_bounds = array<i64: 2, 1>, scalar_prefetch = 0 : i64, scratch_operands = 0 : i64, tpu.core_type = #tpu.core_type<tc>, window_params = [{transform_indices = @transform_0, window_bounds = array<i64: 1, 8, 32>}, {transform_indices = @transform_1, window_bounds = array<i64: 1, 128, 32>}, {pipeline_mode = #tpu.pipeline_mode<synchronous>, transform_indices = @transform_2, window_bounds = array<i64: 32, 512>}, {pipeline_mode = #tpu.pipeline_mode<synchronous>, transform_indices = @transform_3, window_bounds = array<i64: 512, 16>}, {transform_indices = @transform_4, window_bounds = array<i64: 1, 8, 128>}]} {
    %c0 = arith.constant 0 : index
    %c0_0 = arith.constant 0 : index
    %0 = vector.load %arg4[%c0, %c0_0] : memref<32x512xf32, #tpu.memory_space<vmem>>, vector<32x512xf32>
    %c0_1 = arith.constant 0 : index
    %c0_2 = arith.constant 0 : index
    %1 = vector.load %arg5[%c0_1, %c0_2] : memref<512x16xf32, #tpu.memory_space<vmem>>, vector<512x16xf32>
    %c0_3 = arith.constant 0 : index
    %c0_4 = arith.constant 0 : index
    %c0_5 = arith.constant 0 : index
    %2 = vector.load %arg2[%c0_3, %c0_4, %c0_5] : memref<1x8x32xf32, #tpu.memory_space<vmem>>, vector<1x8x32xf32>
    %3 = vector.shape_cast %2 : vector<1x8x32xf32> to vector<8x32xf32>
    %cst = arith.constant dense<0.000000e+00> : vector<8x512xf32>
    %4 = tpu.matmul %3, %0, %cst {dimension_numbers = #tpu.dot_dimension_numbers<[1], [0], [0], [1], [0, 0, 1, 1], [], []>} : vector<8x32xf32>, vector<32x512xf32>, vector<8x512xf32> -> vector<8x512xf32>
    %5 = arith.mulf %4, %4 : vector<8x512xf32>
    %cst_6 = arith.constant dense<0.000000e+00> : vector<8x16xf32>
    %6 = tpu.matmul %5, %1, %cst_6 {dimension_numbers = #tpu.dot_dimension_numbers<[1], [0], [0], [1], [0, 0, 1, 1], [], []>} : vector<8x512xf32>, vector<512x16xf32>, vector<8x16xf32> -> vector<8x16xf32>
    %cst_7 = arith.constant 1.000000e-24 : f32
    %7 = vector.broadcast %cst_7 : f32 to vector<8x16xf32>
    %8 = arith.maximumf %6, %7 : vector<8x16xf32>
    %9 = math.rsqrt %8 : vector<8x16xf32>
    %cst_8 = arith.constant 2.500000e-01 : f32
    %10 = vector.broadcast %cst_8 : f32 to vector<8x16xf32>
    %11 = arith.mulf %9, %10 : vector<8x16xf32>
    %cst_9 = arith.constant dense<0.000000e+00> : vector<8x512xf32>
    %12 = tpu.matmul %11, %1, %cst_9 {dimension_numbers = #tpu.dot_dimension_numbers<[1], [1], [0], [0], [0, 0, 1, 0], [], []>} : vector<8x16xf32>, vector<512x16xf32>, vector<8x512xf32> -> vector<8x512xf32>
    %13 = arith.mulf %4, %12 : vector<8x512xf32>
    %14 = arith.truncf %13 : vector<8x512xf32> to vector<8x512xbf16>
    %c0_10 = arith.constant 0 : index
    %c0_11 = arith.constant 0 : index
    %c0_12 = arith.constant 0 : index
    %15 = vector.load %arg3[%c0_10, %c0_11, %c0_12] : memref<1x128x32xf32, #tpu.memory_space<vmem>>, vector<1x128x32xf32>
    %16 = vector.shape_cast %15 : vector<1x128x32xf32> to vector<128x32xf32>
    %cst_13 = arith.constant dense<0.000000e+00> : vector<128x512xf32>
    %17 = tpu.matmul %16, %0, %cst_13 {dimension_numbers = #tpu.dot_dimension_numbers<[1], [0], [0], [1], [0, 0, 1, 1], [], []>} : vector<128x32xf32>, vector<32x512xf32>, vector<128x512xf32> -> vector<128x512xf32>
    %18 = arith.mulf %17, %17 : vector<128x512xf32>
    %cst_14 = arith.constant dense<0.000000e+00> : vector<128x16xf32>
    %19 = tpu.matmul %18, %1, %cst_14 {dimension_numbers = #tpu.dot_dimension_numbers<[1], [0], [0], [1], [0, 0, 1, 1], [], []>} : vector<128x512xf32>, vector<512x16xf32>, vector<128x16xf32> -> vector<128x16xf32>
    %cst_15 = arith.constant 1.000000e-24 : f32
    %20 = vector.broadcast %cst_15 : f32 to vector<128x16xf32>
    %21 = arith.maximumf %19, %20 : vector<128x16xf32>
    %22 = math.rsqrt %21 : vector<128x16xf32>
    %cst_16 = arith.constant 2.500000e-01 : f32
    %23 = vector.broadcast %cst_16 : f32 to vector<128x16xf32>
    %24 = arith.mulf %22, %23 : vector<128x16xf32>
    %cst_17 = arith.constant dense<0.000000e+00> : vector<128x512xf32>
    %25 = tpu.matmul %24, %1, %cst_17 {dimension_numbers = #tpu.dot_dimension_numbers<[1], [1], [0], [0], [0, 0, 1, 0], [], []>} : vector<128x16xf32>, vector<512x16xf32>, vector<128x512xf32> -> vector<128x512xf32>
    %26 = arith.mulf %17, %25 : vector<128x512xf32>
    %27 = arith.truncf %26 : vector<128x512xf32> to vector<128x512xbf16>
    %cst_18 = arith.constant dense<0.000000e+00> : vector<8x128xf32>
    %28 = tpu.matmul %14, %27, %cst_18 {dimension_numbers = #tpu.dot_dimension_numbers<[1], [1], [0], [0], [0, 0, 1, 0], [], []>} : vector<8x512xbf16>, vector<128x512xbf16>, vector<8x128xf32> -> vector<8x128xf32>
    %cst_19 = arith.constant 0.000000e+00 : f32
    %29 = vector.broadcast %cst_19 : f32 to vector<8x128xf32>
    %30 = arith.cmpf ogt, %28, %29 : vector<8x128xf32>
    %cst_20 = arith.constant 0.000000e+00 : f32
    %31 = vector.broadcast %cst_20 : f32 to vector<8x128xf32>
    %32 = arith.select %30, %28, %31 : vector<8x128xi1>, vector<8x128xf32>
    %c0_21 = arith.constant 0 : index
    %c0_22 = arith.constant 0 : index
    %c0_23 = arith.constant 0 : index
    %33 = vector.load %arg6[%c0_21, %c0_22, %c0_23] : memref<1x8x128xf32, #tpu.memory_space<vmem>>, vector<1x8x128xf32>
    %34 = vector.shape_cast %33 : vector<1x8x128xf32> to vector<8x128xf32>
    %35 = vector.shape_cast %32 : vector<8x128xf32> to vector<1x8x128xf32>
    tpu.vector_store %arg6[%c0_21, %c0_22, %c0_23], %35 {strides = array<i32>} : memref<1x8x128xf32, #tpu.memory_space<vmem>>, vector<1x8x128xf32>,
    return
  }
  func.func @transform_0(%arg0: i32, %arg1: i32) -> (i32, i32, i32) {
    %c0_i32 = arith.constant 0 : i32
    %c0_i32_0 = arith.constant 0 : i32
    return %arg0, %arg1, %c0_i32 : i32, i32, i32
  }
  func.func @transform_1(%arg0: i32, %arg1: i32) -> (i32, i32, i32) {
    %c0_i32 = arith.constant 0 : i32
    %c0_i32_0 = arith.constant 0 : i32
    %c0_i32_1 = arith.constant 0 : i32
    return %arg0, %c0_i32, %c0_i32_0 : i32, i32, i32
  }
  func.func @transform_2(%arg0: i32, %arg1: i32) -> (i32, i32) {
    %c0_i32 = arith.constant 0 : i32
    %c0_i32_0 = arith.constant 0 : i32
    %c0_i32_1 = arith.constant 0 : i32
    return %c0_i32, %c0_i32_0 : i32, i32
  }
  func.func @transform_3(%arg0: i32, %arg1: i32) -> (i32, i32) {
    %c0_i32 = arith.constant 0 : i32
    %c0_i32_0 = arith.constant 0 : i32
    %c0_i32_1 = arith.constant 0 : i32
    return %c0_i32, %c0_i32_0 : i32, i32
  }
  func.func @transform_4(%arg0: i32, %arg1: i32) -> (i32, i32, i32) {
    %c0_i32 = arith.constant 0 : i32
    %c0_i32_0 = arith.constant 0 : i32
    return %arg0, %arg1, %c0_i32 : i32, i32, i32
  }
}

</mosaic_0001>

<bundles_post_ra>
// kernel: tpu_custom_call.1
= control target key start
LH: loop header
LB: loop body
LE: loop exit
PB: predicated region body
PF: predicated region fallthrough
CT: control target
= control target key end

     0   :  { %9 = vsyncpa [#allocation3], 0  ;;  %s4807_s0 = inlined_call_operand.vmem [shape: f32[2,8,32], index: 0, kind: input, shape index: {}]   ;;  %s4808_s1 = inlined_call_operand.vmem [shape: f32[2,128,32], index: 1, kind: input, shape index: {}]   ;;  %s4809_s2 = inlined_call_operand.vmem [shape: f32[32,512], index: 2, kind: input, shape index: {}]   ;;  %s4810_s3 = inlined_call_operand.vmem [shape: f32[512,16], index: 3, kind: input, shape index: {}]   ;;  %s4811_s4 = inlined_call_operand.hbm [shape: f32[2,8,128], index: 4, kind: output, shape index: {}]  }
   0x1   :  { %11 = vsyncpa [#allocation3 + $0x1], 0  ;;  %s3580_s15 = smov 0   ;;  %s3582_s16 = smov 0  }
   0x2   :  { %s3584_s17 = smov 0   ;;  %s3586_s18 = smov 0  }
   0x3   :  { %s3588_s19 = smov 0   ;;  %s3590_s20 = smov 0  }
   0x4 LB: > { %s2394_s21 = sadd.s32 4294967295, %s3551_s20   ;;  %s2395_s22 = sadd.s32 4294967294, %s3551_s20   ;;  %s3551_s20 = sphi %s3590_s20, %s17_s20   ;;  %s3547_s19 = sphi %s3588_s19, %s4899_s19   ;;  %s3543_s18 = sphi %s3586_s18, %s4898_s18   ;;  %s3539_s17 = sphi %s3584_s17, %s4897_s17   ;;  %s3535_s16 = sphi %s3582_s16, %s4896_s16   ;;  %s3531_s15 = sphi %s3580_s15, %s4895_s15  }
   0x5   : > { %s29_s23 = sadd.s32 1, %s3547_s19  ;;  %s134_s24 = sadd.s32 1, %s3539_s17 }
   0x6   : > { %p31_p0 = scmp.ge.s32.totalorder %s29_s23, 2  ;;  %p144_p1 = scmp.ne.s32.totalorder %s3539_s17, %s3535_s16 }
   0x7   : > { %p145_p2 = scmp.eq.s32.totalorder %s2394_s21, 1  ;;  %p150_p3 = scmp.ne.s32.totalorder %s3535_s16, %s3531_s15 }
   0x8   : > { %s4901_s23 = smov (%p31_p0, %s29_s23), 0  ;;  %p151_p5 = scmp.eq.s32.totalorder %s2395_s22, 1 }
   0x9   : > { %p3620_p4 = por %p145_p2, %p144_p1  ;;  %s129_s26 = ssub.s32 %s3547_s19, %s4901_s23 }
   0xa   : > { %p2398_p6 = scmp.ge.s32.totalorder %s3551_s20, 1  ;;  %p132_p7 = scmp.eq.s32.totalorder %s129_s26, 0 }
   0xb   : > { %p3627_p8 = por %p151_p5, %p150_p3  ;;  %p193_p9 = scmp.lt.s32.totalorder %s3551_s20, 3 }
   0xc   : > { %s3633_s28 = scalar_select %p132_p7, %s3539_s17, %s134_s24  }
   0xd   : > { %p194_p10 = pnand %p2398_p6, %p193_p9 }
   0xf   : > { %197 = sbr.rel (%p194_p10) target bundleno = 1456 (0x5b0), region = 36 }
  0x16   : > { %v240_v0 = vld [vmem:[%s4809_s2 + $0x8] sm:$0xff]  ;;  %v242_v2 = vld [vmem:[%s4809_s2 + $0x18] sm:$0xff]  ;;  %p226_p11 = scmp.lt.s32.totalorder %s3543_s18, 1  ;;  %v239_v5 = vld [vmem:[%s4809_s2] sm:$0xff]  ;;  %v3553_v7 = vmov 0.0   ;;  %vm320_vm0 = vcmask 261120  }
  0x17   : > { %v244_v1 = vld [vmem:[%s4809_s2 + $0x28] sm:$0xff]  ;;  %v246_v4 = vld [vmem:[%s4809_s2 + $0x38] sm:$0xff]  ;;  %v243_v6 = vld [vmem:[%s4809_s2 + $0x20] sm:$0xff]  ;;  %388 = vmatprep.mubr.f32.mxu0 %v3553_v7  ;;  %459 = vmatprep.mubr.f32.mxu1 %v3553_v7  ;;  %vm613_vm1 = vcmask 130048   ;;  %s2600_s7 = sshll.u32 %s3543_s18, 7  ;;  %s3554_s14 = smov [#allocation2]  }
  0x18   : > { %v3645_v3 = vpack.c.bf16 %v244_v1, %v240_v0  ;;  %v3658_v8 = vpack.c.bf16 %v246_v4, %v242_v2  ;;  %v3660_v9 = vpack.c.bf16 %v243_v6, %v239_v5  ;;  %v241_v10 = vld [vmem:[%s4809_s2 + $0x10] sm:$0xff]  ;;  %v248_v12 = vld [vmem:[%s4809_s2 + $0x48] sm:$0xff]  ;;  %s3672_s5 = scalar_select %p226_p11, %s3543_s18, 1  ;;  %v250_v15 = vld [vmem:[%s4809_s2 + $0x58] sm:$0xff] }
  0x19   : > { %v245_v11 = vld [vmem:[%s4809_s2 + $0x30] sm:$0xff]  ;;  %v252_v14 = vld [vmem:[%s4809_s2 + $0x68] sm:$0xff]  ;;  %v254_v16 = vld [vmem:[%s4809_s2 + $0x78] sm:$0xff]  ;;  %s4760_s12 = scalar_lea.hbm %s4811_s4, %s2600_s7  ;;  %s3477_s21 = sshll.u32 %s3554_s14, 4  ;;  %s3478_s21 = int_to_ptr.vmem [resolvable:$false] %s3477_s21 }
  0x1a   : > { %3031 = vmatprep.subr.bf16.mxu0 %v3645_v3  ;;  %v3675_v13 = vpack.c.bf16 %v245_v11, %v241_v10  ;;  %3039 = vmatprep.subr.bf16.mxu1 %v3658_v8  ;;  %v3688_v17 = vpack.c.bf16 %v252_v14, %v248_v12  ;;  %v3690_v18 = vpack.c.bf16 %v254_v16, %v250_v15  ;;  %v247_v19 = vld [vmem:[%s4809_s2 + $0x40] sm:$0xff]  ;;  %v249_v21 = vld [vmem:[%s4809_s2 + $0x50] sm:$0xff]  ;;  %s2400_s26 = sshll.u32 %s3672_s5, 3  ;;  %v272_v25 = vld [vmem:[%s4810_s3 + $0x88] sm:$0xff]  ;;  %s2603_s24 = sshll.u32 %s3672_s5, 7 }
  0x1b   : > { %3033 = vmatpush1.bf16.msra.mxu0 %v3660_v9  ;;  %v251_v20 = vld [vmem:[%s4809_s2 + $0x60] sm:$0xff]  ;;  %v253_v23 = vld [vmem:[%s4809_s2 + $0x70] sm:$0xff]  ;;  %s232_s8 = scalar_lea.vmem %s4807_s0, %s2400_s26  ;;  %v304_v30 = vld [vmem:[%s4810_s3 + $0x188] sm:$0xff]  ;;  %s4137_s30 = scalar_lea.vmem %s4808_s1, %s2603_s24 }
  0x1c   : > { %3041 = vmatpush1.bf16.msra.mxu1 %v3675_v13  ;;  %v3703_v22 = vpack.c.bf16 %v251_v20, %v247_v19  ;;  %v271_v24 = vld [vmem:[%s4810_s3 + $0x80] sm:$0xff]  ;;  %3035 = vmatprep.subr.bf16.mxu0 %v3688_v17  ;;  %v3719_v26 = vpack.c.bf16 %v253_v23, %v249_v21  ;;  %v256_v33 = vld [vmem:[%s4810_s3 + $0x8] sm:$0xff]  ;;  %v273_v37 = vld [vmem:[%s4810_s3 + $0x90] sm:$0xff]  ;;  %s223_s5 = sand.u32 1, %s3535_s16   ;;  %s3479_s22 = scalar_lea.vmem %s3478_s21, 256 }
  0x1d   : > { %3043 = vmatprep.subr.bf16.mxu1 %v3690_v18  ;;  %v319_v27 = vld [vmem:[%s232_s8] sm:$0xff]  ;;  %v3721_v28 = vpack.c.bf16 %v272_v25, %v271_v24  ;;  %v288_v36 = vld [vmem:[%s4810_s3 + $0x108] sm:$0xff]  ;;  %v274_v38 = vld [vmem:[%s4810_s3 + $0x98] sm:$0xff]  ;;  %s2399_s6 = sshll.u32 %s223_s5, 3  ;;  %s2297_s18 = scalar_lea.sflag [#allocation3], %s223_s5 }
  0x1e   : > { %v303_v29 = vld [vmem:[%s4810_s3 + $0x180] sm:$0xff]  ;;  %v3756_v40 = vpack.c.bf16 %v274_v38, %v273_v37  ;;  %v305_v41 = vld [vmem:[%s4810_s3 + $0x190] sm:$0xff]  ;;  %v306_v42 = vld [vmem:[%s4810_s3 + $0x198] sm:$0xff]  ;;  %s225_s8 = scalar_lea.vmem [#allocation2], %s2399_s6 }
  0x1f   : > { %v3729_v31 = vpack.c.bf16 %v304_v30, %v303_v29  ;;  %v255_v32 = vld [vmem:[%s4810_s3] sm:$0xff]  ;;  %3037 = vmatpush1.bf16.msra.mxu0 %v3703_v22  ;;  %v257_v43 = vld [vmem:[%s4810_s3 + $0x10] sm:$0xff]  ;;  %v3768_v44 = vpack.c.bf16 %v306_v42, %v305_v41  ;;  %v258_v45 = vld [vmem:[%s4810_s3 + $0x18] sm:$0xff]  ;;  %s2311_s9 = sshll.u32 %s225_s8, 4  ;;  %s4762_s9 = int_to_ptr.vmem [resolvable:$true] %s2311_s9 }
  0x20   : > { %v287_v34 = vld [vmem:[%s4810_s3 + $0x100] sm:$0xff]  ;;  %v3741_v35 = vpack.c.bf16 %v256_v33, %v255_v32  ;;  %3045 = vmatpush1.bf16.msra.mxu1 %v3719_v26  ;;  %3047 = vmatprep.subr.bf16.mxu0 %v3721_v28  ;;  %v289_v46 = vld [vmem:[%s4810_s3 + $0x110] sm:$0xff]  ;;  %v290_v47 = vld [vmem:[%s4810_s3 + $0x118] sm:$0xff]  ;;  %v3791_v51 = vpack.c.bf16 %v258_v45, %v257_v43  ;;  %s3473_s13 = scalar_lea.vmem %s4762_s9, 128  ;;  %p3480_p1 = scmp.lt.s32.totalorder %s4762_s9, %s3478_s21 }
  0x21   : > { %v3754_v39 = vpack.c.bf16 %v288_v36, %v287_v34  ;;  %3079 = vmatprep.subr.bf16.mxu1 %v3729_v31  ;;  %v275_v48 = vld [vmem:[%s4810_s3 + $0xa0] sm:$0xff]  ;;  %v276_v49 = vld [vmem:[%s4810_s3 + $0xa8] sm:$0xff]  ;;  %v3798_v53 = vpack.c.bf16 %v290_v47, %v289_v46  ;;  %v277_v60 = vld [vmem:[%s4810_s3 + $0xb0] sm:$0xff]  ;;  %p3474_p12 = scmp.ne.s32.totalorder %s4762_s9, %s3473_s13  ;;  %p3481_p2 = scmp.lt.s32.totalorder %s3479_s22, %s3473_s13 }
  0x22   : > { %2403 = vmatmul.mubr.msk.f32.vlgmr.msra.gmra.mrb[0].mxu0 %vm320_vm0, %v319_v27  ;;  %v307_v50 = vld [vmem:[%s4810_s3 + $0x1a0] sm:$0xff]  ;;  %v308_v52 = vld [vmem:[%s4810_s3 + $0x1a8] sm:$0xff]  ;;  %v3800_v54 = vpack.c.bf16 %v276_v49, %v275_v48  ;;  %v278_v61 = vld [vmem:[%s4810_s3 + $0xb8] sm:$0xff] }
  0x23   : > { %2404 = vmatmul.mubr.msk.f32.vlgmr.msra.gmra.mrb[0].mxu1 %vm320_vm0, %v319_v27  ;;  %3049 = vmatpush3.bf16.msra.mxu0 %v3741_v35  ;;  %v259_v55 = vld [vmem:[%s4810_s3 + $0x20] sm:$0xff]  ;;  %v260_v56 = vld [vmem:[%s4810_s3 + $0x28] sm:$0xff]  ;;  %v3812_v58 = vpack.c.bf16 %v308_v52, %v307_v50  ;;  %v309_v62 = vld [vmem:[%s4810_s3 + $0x1b0] sm:$0xff]  ;;  %v3836_v2 = vpack.c.bf16 %v278_v61, %v277_v60  ;;  %p3475_p13 = pnand %p3474_p12, %p3620_p4  ;;  %p3482_p3 = por %p3481_p2, %p3480_p1 }
  0x24   : > { %3081 = vmatpush3.bf16.msra.mxu1 %v3754_v39  ;;  %3051 = vmatprep.subr.bf16.mxu0 %v3756_v40  ;;  %v291_v57 = vld [vmem:[%s4810_s3 + $0x120] sm:$0xff]  ;;  %v292_v59 = vld [vmem:[%s4810_s3 + $0x128] sm:$0xff]  ;;  %v310_v63 = vld [vmem:[%s4810_s3 + $0x1b8] sm:$0xff]  ;;  %v3830_v0 = vpack.c.bf16 %v260_v56, %v259_v55 }
  0x25   : > { %3083 = vmatprep.subr.bf16.mxu1 %v3768_v44  ;;  %v3834_v1 = vpack.c.bf16 %v292_v59, %v291_v57  ;;  %v261_v4 = vld [vmem:[%s4810_s3 + $0x30] sm:$0xff]  ;;  %v262_v5 = vld [vmem:[%s4810_s3 + $0x38] sm:$0xff]  ;;  %v3848_v10 = vpack.c.bf16 %v310_v63, %v309_v62  ;;  %v279_v12 = vld [vmem:[%s4810_s3 + $0xc0] sm:$0xff]  ;;  %p3476_p0 = pneg %p3475_p13 }
  0x26   : > { %v293_v6 = vld [vmem:[%s4810_s3 + $0x130] sm:$0xff]  ;;  %v294_v11 = vld [vmem:[%s4810_s3 + $0x138] sm:$0xff]  ;;  %v280_v14 = vld [vmem:[%s4810_s3 + $0xc8] sm:$0xff]  ;;  %v3866_v19 = vpack.c.bf16 %v262_v5, %v261_v4 }
  0x27   : > { %3053 = vmatpush3.bf16.msra.mxu0 %v3791_v51  ;;  %v311_v15 = vld [vmem:[%s4810_s3 + $0x1c0] sm:$0xff]  ;;  %v312_v16 = vld [vmem:[%s4810_s3 + $0x1c8] sm:$0xff]  ;;  %v3870_v20 = vpack.c.bf16 %v294_v11, %v293_v6  ;;  %v3872_v21 = vpack.c.bf16 %v280_v14, %v279_v12  ;;  %v281_v30 = vld [vmem:[%s4810_s3 + $0xd0] sm:$0xff]  ;;  %p3483_p5 = pnand %p3482_p3, %p3476_p0 }
  0x28   : > { %3085 = vmatpush3.bf16.msra.mxu1 %v3798_v53  ;;  %3055 = vmatprep.subr.bf16.mxu0 %v3800_v54  ;;  %v263_v23 = vld [vmem:[%s4810_s3 + $0x40] sm:$0xff]  ;;  %v264_v24 = vld [vmem:[%s4810_s3 + $0x48] sm:$0xff]  ;;  %v3884_v27 = vpack.c.bf16 %v312_v16, %v311_v15  ;;  %v282_v32 = vld [vmem:[%s4810_s3 + $0xd8] sm:$0xff] }
  0x29   : > { %3087 = vmatprep.subr.bf16.mxu1 %v3812_v58  ;;  %v295_v25 = vld [vmem:[%s4810_s3 + $0x140] sm:$0xff]  ;;  %v296_v29 = vld [vmem:[%s4810_s3 + $0x148] sm:$0xff]  ;;  %v313_v33 = vld [vmem:[%s4810_s3 + $0x1d0] sm:$0xff]  ;;  %v3902_v36 = vpack.c.bf16 %v264_v24, %v263_v23  ;;  %v3908_v38 = vpack.c.bf16 %v282_v32, %v281_v30 }
  0x2a   : > { %v314_v34 = vld [vmem:[%s4810_s3 + $0x1d8] sm:$0xff]  ;;  %v3906_v37 = vpack.c.bf16 %v296_v29, %v295_v25  ;;  %v265_v41 = vld [vmem:[%s4810_s3 + $0x50] sm:$0xff]  ;;  %v283_v47 = vld [vmem:[%s4810_s3 + $0xe0] sm:$0xff] }
  0x2b   : > { %3057 = vmatpush3.bf16.msra.mxu0 %v3830_v0  ;;  %v266_v42 = vld [vmem:[%s4810_s3 + $0x58] sm:$0xff]  ;;  %v297_v43 = vld [vmem:[%s4810_s3 + $0x150] sm:$0xff]  ;;  %v3920_v45 = vpack.c.bf16 %v314_v34, %v313_v33  ;;  %v284_v48 = vld [vmem:[%s4810_s3 + $0xe8] sm:$0xff] }
  0x2c   : > { %3089 = vmatpush3.bf16.msra.mxu1 %v3834_v1  ;;  %3059 = vmatprep.subr.bf16.mxu0 %v3836_v2  ;;  %v298_v46 = vld [vmem:[%s4810_s3 + $0x158] sm:$0xff]  ;;  %v315_v49 = vld [vmem:[%s4810_s3 + $0x1e0] sm:$0xff]  ;;  %v316_v50 = vld [vmem:[%s4810_s3 + $0x1e8] sm:$0xff]  ;;  %v3938_v52 = vpack.c.bf16 %v266_v42, %v265_v41  ;;  %v3944_v56 = vpack.c.bf16 %v284_v48, %v283_v47 }
  0x2d   : > { %3091 = vmatprep.subr.bf16.mxu1 %v3848_v10  ;;  %v3942_v55 = vpack.c.bf16 %v298_v46, %v297_v43  ;;  %v267_v57 = vld [vmem:[%s4810_s3 + $0x60] sm:$0xff]  ;;  %v268_v59 = vld [vmem:[%s4810_s3 + $0x68] sm:$0xff]  ;;  %v3953_v60 = vpack.c.bf16 %v316_v50, %v315_v49  ;;  %v285_v5 = vld [vmem:[%s4810_s3 + $0xf0] sm:$0xff] }
  0x2e   : > { %v299_v61 = vld [vmem:[%s4810_s3 + $0x160] sm:$0xff]  ;;  %v300_v62 = vld [vmem:[%s4810_s3 + $0x168] sm:$0xff]  ;;  %v3962_v63 = vpack.c.bf16 %v268_v59, %v267_v57  ;;  %v286_v6 = vld [vmem:[%s4810_s3 + $0xf8] sm:$0xff] }
  0x2f   : > { %3061 = vmatpush3.bf16.msra.mxu0 %v3866_v19  ;;  %v3966_v4 = vpack.c.bf16 %v300_v62, %v299_v61  ;;  %v317_v11 = vld [vmem:[%s4810_s3 + $0x1f0] sm:$0xff]  ;;  %v3980_v12 = vpack.c.bf16 %v286_v6, %v285_v5  ;;  %v318_v14 = vld [vmem:[%s4810_s3 + $0x1f8] sm:$0xff]  ;;  %vm4009_vm2 = vmpackc.low %vm613_vm1, %vm613_vm1 }
  0x30   : > { %3093 = vmatpush3.bf16.msra.mxu1 %v3870_v20  ;;  %3063 = vmatprep.subr.bf16.mxu0 %v3872_v21  ;;  %v269_v15 = vld [vmem:[%s4810_s3 + $0x70] sm:$0xff]  ;;  %v270_v16 = vld [vmem:[%s4810_s3 + $0x78] sm:$0xff]  ;;  %v3991_v23 = vpack.c.bf16 %v318_v14, %v317_v11 }
  0x31   : > { %3095 = vmatprep.subr.bf16.mxu1 %v3884_v27  ;;  %v3993_v24 = vpack.c.bf16 %v270_v16, %v269_v15  ;;  %v301_v25 = vld [vmem:[%s4810_s3 + $0x170] sm:$0xff]  ;;  %v302_v29 = vld [vmem:[%s4810_s3 + $0x178] sm:$0xff]  ;;  %v967_v15 = vld [vmem:[%s4137_s30 + $0x40] sm:$0xff] }
  0x32   : > { %v4002_v30 = vpack.c.bf16 %v302_v29, %v301_v25  ;;  %v968_v16 = vld [vmem:[%s4137_s30 + $0x48] sm:$0xff]  ;;  %v971_v25 = vld [vmem:[%s4137_s30 + $0x60] sm:$0xff] }
  0x33   : > { %3065 = vmatpush3.bf16.msra.mxu0 %v3902_v36  ;;  %v972_v29 = vld [vmem:[%s4137_s30 + $0x68] sm:$0xff] }
  0x34   : > { %3097 = vmatpush3.bf16.msra.mxu1 %v3906_v37  ;;  %3067 = vmatprep.subr.bf16.mxu0 %v3908_v38 }
  0x35   : > { %3099 = vmatprep.subr.bf16.mxu1 %v3920_v45 }
  0x37   : > { %3069 = vmatpush3.bf16.msra.mxu0 %v3938_v52 }
  0x38   : > { %3101 = vmatpush3.bf16.msra.mxu1 %v3942_v55  ;;  %3071 = vmatprep.subr.bf16.mxu0 %v3944_v56 }
  0x39   : > { %3103 = vmatprep.subr.bf16.mxu1 %v3953_v60 }
  0x3b   : > { %3073 = vmatpush3.bf16.msra.mxu0 %v3962_v63 }
  0x3c   : > { %3105 = vmatpush3.bf16.msra.mxu1 %v3966_v4  ;;  %3075 = vmatprep.subr.bf16.mxu0 %v3980_v12 }
  0x3d   : > { %3107 = vmatprep.subr.bf16.mxu1 %v3991_v23 }
  0x3f   : > { %3077 = vmatpush3.bf16.msra.mxu0 %v3993_v24 }
  0x40   : > { %3109 = vmatpush3.bf16.msra.mxu1 %v4002_v30  ;;  %3112 = vmatprep.subr.msk.bf16.mxu0 %vm4009_vm2, %v3721_v28 }
  0x41   : > { %3160 = vmatprep.subr.msk.bf16.mxu1 %vm4009_vm2, %v3729_v31 }
  0xf5   : > { %v4019_v33 = vpop.f32.mrb[0].mxu0 }
  0xf6   : > { %v4021_v34 = vpop.f32.mrb[0].mxu1  ;;  %v4023_v41 = vpop.f32.mrb[1].mxu0  ;;  %v466_v46 = vmul.f32 %v4019_v33, %v4019_v33 }
  0xf7   : > { %v467_v42 = vmul.f32 %v4023_v41, %v4023_v41  ;;  %v4027_v43 = vpop.f32.mrb[1].mxu1  ;;  %v468_v48 = vmul.f32 %v4021_v34, %v4021_v34 }
  0xf8   : > { %v469_v47 = vmul.f32 %v4027_v43, %v4027_v43 }
  0xf9   : > { %534 = vmatprep.mubr.f32.mxu0 %v467_v42  ;;  %v973_v42 = vld [vmem:[%s4137_s30 + $0x70] sm:$0xff] }
  0xfa   : > { %604 = vmatprep.mubr.f32.mxu1 %v469_v47  ;;  %535 = vmatmul.mubr.f32.vlgmr.msra.gmra.mrb[2].mxu0 %v466_v46  ;;  %v974_v46 = vld [vmem:[%s4137_s30 + $0x78] sm:$0xff] }
  0xfb   : > { %605 = vmatmul.mubr.f32.vlgmr.msra.gmra.mrb[2].mxu1 %v468_v48  ;;  %3115 = vmatpush3.bf16.xpose.msk.msra.mxu0 %vm4009_vm2, %v3741_v35 }
  0xfc   : > { %3163 = vmatpush3.bf16.xpose.msk.msra.mxu1 %vm4009_vm2, %v3754_v39  ;;  %3118 = vmatprep.subr.msk.bf16.mxu0 %vm4009_vm2, %v3756_v40 }
  0xfd   : > { %3166 = vmatprep.subr.msk.bf16.mxu1 %vm4009_vm2, %v3768_v44 }
 0x103   : > { %3121 = vmatpush3.bf16.xpose.msk.msra.mxu0 %vm4009_vm2, %v3791_v51 }
 0x104   : > { %3169 = vmatpush3.bf16.xpose.msk.msra.mxu1 %vm4009_vm2, %v3798_v53  ;;  %3124 = vmatprep.subr.msk.bf16.mxu0 %vm4009_vm2, %v3800_v54 }
 0x105   : > { %3172 = vmatprep.subr.msk.bf16.mxu1 %vm4009_vm2, %v3812_v58 }
 0x10b   : > { %3127 = vmatpush3.bf16.xpose.msk.msra.mxu0 %vm4009_vm2, %v3830_v0 }
 0x10c   : > { %3175 = vmatpush3.bf16.xpose.msk.msra.mxu1 %vm4009_vm2, %v3834_v1  ;;  %3130 = vmatprep.subr.msk.bf16.mxu0 %vm4009_vm2, %v3836_v2 }
 0x10d   : > { %3178 = vmatprep.subr.msk.bf16.mxu1 %vm4009_vm2, %v3848_v10 }
 0x113   : > { %3133 = vmatpush3.bf16.xpose.msk.msra.mxu0 %vm4009_vm2, %v3866_v19 }
 0x114   : > { %3181 = vmatpush3.bf16.xpose.msk.msra.mxu1 %vm4009_vm2, %v3870_v20  ;;  %3136 = vmatprep.subr.msk.bf16.mxu0 %vm4009_vm2, %v3872_v21 }
 0x115   : > { %3184 = vmatprep.subr.msk.bf16.mxu1 %vm4009_vm2, %v3884_v27 }
 0x11b   : > { %3139 = vmatpush3.bf16.xpose.msk.msra.mxu0 %vm4009_vm2, %v3902_v36 }
 0x11c   : > { %3187 = vmatpush3.bf16.xpose.msk.msra.mxu1 %vm4009_vm2, %v3906_v37  ;;  %3142 = vmatprep.subr.msk.bf16.mxu0 %vm4009_vm2, %v3908_v38 }
 0x11d   : > { %3190 = vmatprep.subr.msk.bf16.mxu1 %vm4009_vm2, %v3920_v45 }
 0x123   : > { %3145 = vmatpush3.bf16.xpose.msk.msra.mxu0 %vm4009_vm2, %v3938_v52 }
 0x124   : > { %3193 = vmatpush3.bf16.xpose.msk.msra.mxu1 %vm4009_vm2, %v3942_v55  ;;  %3148 = vmatprep.subr.msk.bf16.mxu0 %vm4009_vm2, %v3944_v56 }
 0x125   : > { %3196 = vmatprep.subr.msk.bf16.mxu1 %vm4009_vm2, %v3953_v60 }
 0x12b   : > { %3151 = vmatpush3.bf16.xpose.msk.msra.mxu0 %vm4009_vm2, %v3962_v63 }
 0x12c   : > { %3199 = vmatpush3.bf16.xpose.msk.msra.mxu1 %vm4009_vm2, %v3966_v4  ;;  %3154 = vmatprep.subr.msk.bf16.mxu0 %vm4009_vm2, %v3980_v12 }
 0x12d   : > { %3202 = vmatprep.subr.msk.bf16.mxu1 %vm4009_vm2, %v3991_v23 }
 0x133   : > { %3157 = vmatpush3.bf16.xpose.msk.msra.mxu0 %vm4009_vm2, %v3993_v24 }
 0x134   : > { %3205 = vmatpush3.bf16.xpose.msk.msra.mxu1 %vm4009_vm2, %v4002_v30  ;;  %3207 = vmatprep.subr.bf16.mxu0 %v3645_v3  ;;  %v959_v3 = vld [vmem:[%s4137_s30] sm:$0xff] }
 0x135   : > { %3215 = vmatprep.subr.bf16.mxu1 %v3658_v8  ;;  %v960_v8 = vld [vmem:[%s4137_s30 + $0x8] sm:$0xff] }
 0x1cd   : > { %v2636_v49 = vpop.f32.mrb[2].mxu0 }
 0x1ce   : > { %v2671_v50 = vpop.f32.mrb[2].mxu1  ;;  %v2637_v57 = vpop.f32.mrb[3].mxu0 }
 0x1cf   : > { %v2638_v59 = vadd.f32 %v2637_v57, %v2636_v49  ;;  %v2672_v61 = vpop.f32.mrb[3].mxu1 }
 0x1d0   : > { %v2673_v62 = vadd.f32 %v2672_v61, %v2671_v50 }
 0x1d2   : > { %v607_v5 = vadd.f32 %v2673_v62, %v2638_v59 }
 0x1d4   : > { %v610_v6 = vmax.f32 %v607_v5, 1e-24 }
 0x1d6   : > { %3439 = vrsqrt.f32 %v610_v6 }
 0x1e0   : > { %v3440_v11 = vpop.eup %3439 }
 0x1e1   : > { %v612_v14 = vmul.f32 0.25, %v3440_v11 }
 0x1e3   : > { %2706 = vmatprep.mubr.msk.f32.mxu0 %vm613_vm1, %v612_v14  ;;  %2740 = vmatprep.mubr.msk.f32.mxu1 %vm613_vm1, %v612_v14 }
 0x1e4   : > { %2707 = vmatmul.mubr.msk.f32.vlgmr.msra.gmra.mrb[4].mxu0 %vm613_vm1, %v612_v14  ;;  %2741 = vmatmul.mubr.msk.f32.vlgmr.msra.gmra.mrb[4].mxu1 %vm613_vm1, %v612_v14 }
 0x1e5   : > { %3209 = vmatpush1.bf16.msra.mxu0 %v3660_v9  ;;  %3217 = vmatpush1.bf16.msra.mxu1 %v3675_v13  ;;  %v961_v9 = vld [vmem:[%s4137_s30 + $0x10] sm:$0xff]  ;;  %v962_v13 = vld [vmem:[%s4137_s30 + $0x18] sm:$0xff] }
 0x1e6   : > { %3211 = vmatprep.subr.bf16.mxu0 %v3688_v17  ;;  %3219 = vmatprep.subr.bf16.mxu1 %v3690_v18  ;;  %v963_v17 = vld [vmem:[%s4137_s30 + $0x20] sm:$0xff]  ;;  %v964_v18 = vld [vmem:[%s4137_s30 + $0x28] sm:$0xff] }
 0x1e7   : > { %1087 = vmatprep.mubr.f32.mxu0 %v3553_v7  ;;  %1248 = vmatprep.mubr.f32.mxu1 %v3553_v7 }
 0x1e9   : > { %3213 = vmatpush1.bf16.msra.mxu0 %v3703_v22  ;;  %3221 = vmatpush1.bf16.msra.mxu1 %v3719_v26  ;;  %v965_v22 = vld [vmem:[%s4137_s30 + $0x30] sm:$0xff]  ;;  %v966_v26 = vld [vmem:[%s4137_s30 + $0x38] sm:$0xff] }
 0x1ea   : > { %3223 = vmatprep.subr.bf16.mxu0 %v3721_v28  ;;  %3255 = vmatprep.subr.bf16.mxu1 %v3729_v31 }
 0x1ec   : > { %2471 = vmatmul.mubr.msk.f32.vlgmr.msra.gmra.mrb[6].mxu0 %vm320_vm0, %v959_v3  ;;  %2487 = vmatmul.mubr.msk.f32.vlgmr.msra.gmra.mrb[6].mxu1 %vm320_vm0, %v959_v3 }
 0x1ed   : > { %1093 = vmatprep.mubr.f32.mxu0 %v3553_v7  ;;  %1254 = vmatprep.mubr.f32.mxu1 %v3553_v7 }
 0x1ee   : > { %3225 = vmatpush3.bf16.msra.mxu0 %v3741_v35  ;;  %3257 = vmatpush3.bf16.msra.mxu1 %v3754_v39 }
 0x1ef   : > { %3227 = vmatprep.subr.bf16.mxu0 %v3756_v40  ;;  %3259 = vmatprep.subr.bf16.mxu1 %v3768_v44 }
 0x1f0   : > { %2472 = vmatmul.mubr.msk.f32.gmra.mrb[8].mxu0 %vm320_vm0, %v960_v8  ;;  %2488 = vmatmul.mubr.msk.f32.gmra.mrb[8].mxu1 %vm320_vm0, %v960_v8 }
 0x1f1   : > { %1099 = vmatprep.mubr.f32.mxu0 %v3553_v7  ;;  %1260 = vmatprep.mubr.f32.mxu1 %v3553_v7 }
 0x1f2   : > { %3229 = vmatpush3.bf16.msra.mxu0 %v3791_v51  ;;  %3261 = vmatpush3.bf16.msra.mxu1 %v3798_v53 }
 0x1f3   : > { %3231 = vmatprep.subr.bf16.mxu0 %v3800_v54  ;;  %3263 = vmatprep.subr.bf16.mxu1 %v3812_v58 }
 0x1f4   : > { %2473 = vmatmul.mubr.msk.f32.gmra.mrb[10].mxu0 %vm320_vm0, %v961_v9  ;;  %2489 = vmatmul.mubr.msk.f32.gmra.mrb[10].mxu1 %vm320_vm0, %v961_v9 }
 0x1f5   : > { %1105 = vmatprep.mubr.f32.mxu0 %v3553_v7  ;;  %1266 = vmatprep.mubr.f32.mxu1 %v3553_v7 }
 0x1f6   : > { %3233 = vmatpush3.bf16.msra.mxu0 %v3830_v0  ;;  %3265 = vmatpush3.bf16.msra.mxu1 %v3834_v1 }
 0x1f7   : > { %3235 = vmatprep.subr.bf16.mxu0 %v3836_v2  ;;  %3267 = vmatprep.subr.bf16.mxu1 %v3848_v10 }
 0x1f8   : > { %2474 = vmatmul.mubr.msk.f32.gmra.mrb[12].mxu0 %vm320_vm0, %v962_v13  ;;  %2490 = vmatmul.mubr.msk.f32.gmra.mrb[12].mxu1 %vm320_vm0, %v962_v13 }
 0x1f9   : > { %1111 = vmatprep.mubr.f32.mxu0 %v3553_v7  ;;  %1272 = vmatprep.mubr.f32.mxu1 %v3553_v7 }
 0x1fa   : > { %3237 = vmatpush3.bf16.msra.mxu0 %v3866_v19  ;;  %3269 = vmatpush3.bf16.msra.mxu1 %v3870_v20 }
 0x1fb   : > { %3239 = vmatprep.subr.bf16.mxu0 %v3872_v21  ;;  %3271 = vmatprep.subr.bf16.mxu1 %v3884_v27 }
 0x1fc   : > { %2475 = vmatmul.mubr.msk.f32.gmra.mrb[14].mxu0 %vm320_vm0, %v963_v17  ;;  %2491 = vmatmul.mubr.msk.f32.gmra.mrb[14].mxu1 %vm320_vm0, %v963_v17 }
 0x1fd   : > { %1117 = vmatprep.mubr.f32.mxu0 %v3553_v7  ;;  %1278 = vmatprep.mubr.f32.mxu1 %v3553_v7 }
 0x1fe   : > { %3241 = vmatpush3.bf16.msra.mxu0 %v3902_v36  ;;  %3273 = vmatpush3.bf16.msra.mxu1 %v3906_v37 }
 0x1ff   : > { %3243 = vmatprep.subr.bf16.mxu0 %v3908_v38  ;;  %3275 = vmatprep.subr.bf16.mxu1 %v3920_v45 }
 0x200   : > { %2476 = vmatmul.mubr.msk.f32.gmra.mrb[16].mxu0 %vm320_vm0, %v964_v18  ;;  %2492 = vmatmul.mubr.msk.f32.gmra.mrb[16].mxu1 %vm320_vm0, %v964_v18 }
 0x201   : > { %1123 = vmatprep.mubr.f32.mxu0 %v3553_v7  ;;  %1284 = vmatprep.mubr.f32.mxu1 %v3553_v7 }
 0x202   : > { %3245 = vmatpush3.bf16.msra.mxu0 %v3938_v52  ;;  %3277 = vmatpush3.bf16.msra.mxu1 %v3942_v55 }
 0x203   : > { %3247 = vmatprep.subr.bf16.mxu0 %v3944_v56  ;;  %3279 = vmatprep.subr.bf16.mxu1 %v3953_v60 }
 0x204   : > { %2477 = vmatmul.mubr.msk.f32.gmra.mrb[18].mxu0 %vm320_vm0, %v965_v22  ;;  %2493 = vmatmul.mubr.msk.f32.gmra.mrb[18].mxu1 %vm320_vm0, %v965_v22 }
 0x205   : > { %1129 = vmatprep.mubr.f32.mxu0 %v3553_v7  ;;  %1290 = vmatprep.mubr.f32.mxu1 %v3553_v7 }
 0x206   : > { %3249 = vmatpush3.bf16.msra.mxu0 %v3962_v63  ;;  %3281 = vmatpush3.bf16.msra.mxu1 %v3966_v4 }
 0x207   : > { %3251 = vmatprep.subr.bf16.mxu0 %v3980_v12  ;;  %3283 = vmatprep.subr.bf16.mxu1 %v3991_v23 }
 0x208   : > { %2478 = vmatmul.mubr.msk.f32.gmra.mrb[20].mxu0 %vm320_vm0, %v966_v26  ;;  %2494 = vmatmul.mubr.msk.f32.gmra.mrb[20].mxu1 %vm320_vm0, %v966_v26 }
 0x209   : > { %1135 = vmatprep.mubr.f32.mxu0 %v3553_v7  ;;  %1296 = vmatprep.mubr.f32.mxu1 %v3553_v7 }
 0x20a   : > { %3253 = vmatpush3.bf16.msra.mxu0 %v3993_v24  ;;  %3285 = vmatpush3.bf16.msra.mxu1 %v4002_v30 }
 0x20b   : > { %3288 = vmatprep.subr.msk.bf16.mxu0 %vm4009_vm2, %v3721_v28  ;;  %3336 = vmatprep.subr.msk.bf16.mxu1 %vm4009_vm2, %v3729_v31  ;;  %v969_v28 = vld [vmem:[%s4137_s30 + $0x50] sm:$0xff]  ;;  %v970_v31 = vld [vmem:[%s4137_s30 + $0x58] sm:$0xff] }
 0x20c   : > { %2479 = vmatmul.mubr.msk.f32.gmra.mrb[22].mxu0 %vm320_vm0, %v967_v15  ;;  %2495 = vmatmul.mubr.msk.f32.gmra.mrb[22].mxu1 %vm320_vm0, %v967_v15 }
 0x20d   : > { %1141 = vmatprep.mubr.f32.mxu0 %v3553_v7  ;;  %1302 = vmatprep.mubr.f32.mxu1 %v3553_v7 }
 0x210   : > { %2480 = vmatmul.mubr.msk.f32.gmra.mrb[24].mxu0 %vm320_vm0, %v968_v16  ;;  %2496 = vmatmul.mubr.msk.f32.gmra.mrb[24].mxu1 %vm320_vm0, %v968_v16 }
 0x211   : > { %1147 = vmatprep.mubr.f32.mxu0 %v3553_v7  ;;  %1308 = vmatprep.mubr.f32.mxu1 %v3553_v7 }
 0x214   : > { %2481 = vmatmul.mubr.msk.f32.gmra.mrb[26].mxu0 %vm320_vm0, %v969_v28  ;;  %2497 = vmatmul.mubr.msk.f32.gmra.mrb[26].mxu1 %vm320_vm0, %v969_v28 }
 0x215   : > { %1153 = vmatprep.mubr.f32.mxu0 %v3553_v7  ;;  %1314 = vmatprep.mubr.f32.mxu1 %v3553_v7 }
 0x218   : > { %2482 = vmatmul.mubr.msk.f32.gmra.mrb[28].mxu0 %vm320_vm0, %v970_v31  ;;  %2498 = vmatmul.mubr.msk.f32.gmra.mrb[28].mxu1 %vm320_vm0, %v970_v31 }
 0x219   : > { %1159 = vmatprep.mubr.f32.mxu0 %v3553_v7  ;;  %1320 = vmatprep.mubr.f32.mxu1 %v3553_v7 }
 0x21c   : > { %2483 = vmatmul.mubr.msk.f32.gmra.mrb[30].mxu0 %vm320_vm0, %v971_v25  ;;  %2499 = vmatmul.mubr.msk.f32.gmra.mrb[30].mxu1 %vm320_vm0, %v971_v25 }
 0x21d   : > { %1165 = vmatprep.mubr.f32.mxu0 %v3553_v7  ;;  %1326 = vmatprep.mubr.f32.mxu1 %v3553_v7 }
 0x220   : > { %2484 = vmatmul.mubr.msk.f32.gmra.mrb[32].mxu0 %vm320_vm0, %v972_v29  ;;  %2500 = vmatmul.mubr.msk.f32.gmra.mrb[32].mxu1 %vm320_vm0, %v972_v29 }
 0x221   : > { %1171 = vmatprep.mubr.f32.mxu0 %v3553_v7  ;;  %1332 = vmatprep.mubr.f32.mxu1 %v3553_v7 }
 0x224   : > { %2485 = vmatmul.mubr.msk.f32.gmra.mrb[34].mxu0 %vm320_vm0, %v973_v42  ;;  %2501 = vmatmul.mubr.msk.f32.gmra.mrb[34].mxu1 %vm320_vm0, %v973_v42 }
 0x225   : > { %1177 = vmatprep.mubr.f32.mxu0 %v3553_v7  ;;  %1338 = vmatprep.mubr.f32.mxu1 %v3553_v7 }
 0x228   : > { %2486 = vmatmul.mubr.msk.f32.gmra.mrb[36].mxu0 %vm320_vm0, %v974_v46  ;;  %2502 = vmatmul.mubr.msk.f32.gmra.mrb[36].mxu1 %vm320_vm0, %v974_v46 }
 0x2b7   : > { %v875_v47 = vpop.f32.mrb[4].mxu0  ;;  %v946_v48 = vpop.f32.mrb[4].mxu1 }
 0x2b8   : > { %v4262_v49 = vmul.f32 %v875_v47, %v4019_v33  ;;  %v4265_v50 = vmul.f32 %v946_v48, %v4021_v34  ;;  %v877_v57 = vpop.f32.mrb[5].mxu0  ;;  %v948_v59 = vpop.f32.mrb[5].mxu1 }
 0x2b9   : > { %v4268_v61 = vmul.f32 %v877_v57, %v4023_v41  ;;  %v4271_v7 = vmul.f32 %v948_v59, %v4027_v43 }
 0x2ba   : > { %4841 = vst [vmem:[#allocation5_spill] sm:$0xff] %v4262_v49  ;;  %4842 = vst [vmem:[#allocation6_spill] sm:$0xff] %v4265_v50 }
 0x2bf   : > { %v4273_v62 = vpop.f32.mrb[6].mxu0  ;;  %v4275_v5 = vpop.f32.mrb[6].mxu1 }
 0x2c0   : > { %v4277_v6 = vpop.f32.mrb[7].mxu0  ;;  %v4279_v11 = vpop.f32.mrb[7].mxu1  ;;  %v1345_v41 = vmul.f32 %v4273_v62, %v4273_v62  ;;  %v1347_v43 = vmul.f32 %v4275_v5, %v4275_v5 }
 0x2c1   : > { %v1346_v33 = vmul.f32 %v4277_v6, %v4277_v6  ;;  %v1348_v34 = vmul.f32 %v4279_v11, %v4279_v11 }
 0x2c3   : > { %v4289_v14 = vpop.f32.mrb[8].mxu0  ;;  %v4291_v3 = vpop.f32.mrb[8].mxu1  ;;  %1473 = vmatprep.mubr.f32.mxu0 %v1346_v33  ;;  %1618 = vmatprep.mubr.f32.mxu1 %v1348_v34 }
 0x2c4   : > { %v4293_v8 = vpop.f32.mrb[9].mxu0  ;;  %v4295_v9 = vpop.f32.mrb[9].mxu1  ;;  %1474 = vmatmul.mubr.f32.vlgmr.msra.gmra.mrb[38].mxu0 %v1345_v41  ;;  %1619 = vmatmul.mubr.f32.vlgmr.msra.gmra.mrb[38].mxu1 %v1347_v43  ;;  %v1349_v18 = vmul.f32 %v4289_v14, %v4289_v14  ;;  %v1351_v22 = vmul.f32 %v4291_v3, %v4291_v3 }
 0x2c5   : > { %v1350_v13 = vmul.f32 %v4293_v8, %v4293_v8  ;;  %v1352_v17 = vmul.f32 %v4295_v9, %v4295_v9  ;;  %3291 = vmatpush3.bf16.xpose.msk.msra.mxu0 %vm4009_vm2, %v3741_v35  ;;  %3339 = vmatpush3.bf16.xpose.msk.msra.mxu1 %vm4009_vm2, %v3754_v39 }
 0x2c6   : > { %3294 = vmatprep.subr.msk.bf16.mxu0 %vm4009_vm2, %v3756_v40  ;;  %3342 = vmatprep.subr.msk.bf16.mxu1 %vm4009_vm2, %v3768_v44 }
 0x2c7   : > { %v4317_v26 = vpop.f32.mrb[10].mxu0  ;;  %v4319_v35 = vpop.f32.mrb[10].mxu1  ;;  %1478 = vmatprep.mubr.f32.mxu0 %v1350_v13  ;;  %1623 = vmatprep.mubr.f32.mxu1 %v1352_v17 }
 0x2c8   : > { %v4321_v39 = vpop.f32.mrb[11].mxu0  ;;  %v4323_v15 = vpop.f32.mrb[11].mxu1  ;;  %1479 = vmatmul.mubr.f32.gmra.mrb[40].mxu0 %v1349_v18  ;;  %1624 = vmatmul.mubr.f32.gmra.mrb[40].mxu1 %v1351_v22  ;;  %v1353_v44 = vmul.f32 %v4317_v26, %v4317_v26  ;;  %v1355_v28 = vmul.f32 %v4319_v35, %v4319_v35 }
 0x2c9   : > { %v1354_v16 = vmul.f32 %v4321_v39, %v4321_v39  ;;  %v1356_v40 = vmul.f32 %v4323_v15, %v4323_v15 }
 0x2cb   : > { %v4333_v31 = vpop.f32.mrb[12].mxu0  ;;  %v4335_v25 = vpop.f32.mrb[12].mxu1  ;;  %1483 = vmatprep.mubr.f32.mxu0 %v1354_v16  ;;  %1628 = vmatprep.mubr.f32.mxu1 %v1356_v40 }
 0x2cc   : > { %v4337_v29 = vpop.f32.mrb[13].mxu0  ;;  %v4339_v42 = vpop.f32.mrb[13].mxu1  ;;  %1484 = vmatmul.mubr.f32.gmra.mrb[42].mxu0 %v1353_v44  ;;  %1629 = vmatmul.mubr.f32.gmra.mrb[42].mxu1 %v1355_v28  ;;  %v1357_v48 = vmul.f32 %v4333_v31, %v4333_v31  ;;  %v1359_v57 = vmul.f32 %v4335_v25, %v4335_v25 }
 0x2cd   : > { %v1358_v46 = vmul.f32 %v4337_v29, %v4337_v29  ;;  %v1360_v47 = vmul.f32 %v4339_v42, %v4339_v42  ;;  %3297 = vmatpush3.bf16.xpose.msk.msra.mxu0 %vm4009_vm2, %v3791_v51  ;;  %3345 = vmatpush3.bf16.xpose.msk.msra.mxu1 %vm4009_vm2, %v3798_v53 }
 0x2ce   : > { %3300 = vmatprep.subr.msk.bf16.mxu0 %vm4009_vm2, %v3800_v54  ;;  %3348 = vmatprep.subr.msk.bf16.mxu1 %vm4009_vm2, %v3812_v58 }
 0x2cf   : > { %v4361_v59 = vpop.f32.mrb[14].mxu0  ;;  %v4363_v51 = vpop.f32.mrb[14].mxu1  ;;  %1488 = vmatprep.mubr.f32.mxu0 %v1358_v46  ;;  %1633 = vmatprep.mubr.f32.mxu1 %v1360_v47 }
 0x2d0   : > { %v4365_v53 = vpop.f32.mrb[15].mxu0  ;;  %v4367_v33 = vpop.f32.mrb[15].mxu1  ;;  %1489 = vmatmul.mubr.f32.gmra.mrb[44].mxu0 %v1357_v48  ;;  %1634 = vmatmul.mubr.f32.gmra.mrb[44].mxu1 %v1359_v57  ;;  %v1361_v58 = vmul.f32 %v4361_v59, %v4361_v59  ;;  %v1363_v41 = vmul.f32 %v4363_v51, %v4363_v51 }
 0x2d1   : > { %v1362_v34 = vmul.f32 %v4365_v53, %v4365_v53  ;;  %v1364_v54 = vmul.f32 %v4367_v33, %v4367_v33 }
 0x2d3   : > { %v4377_v43 = vpop.f32.mrb[16].mxu0  ;;  %v4379_v13 = vpop.f32.mrb[16].mxu1  ;;  %1493 = vmatprep.mubr.f32.mxu0 %v1362_v34  ;;  %1638 = vmatprep.mubr.f32.mxu1 %v1364_v54 }
 0x2d4   : > { %v4381_v17 = vpop.f32.mrb[17].mxu0  ;;  %v4383_v18 = vpop.f32.mrb[17].mxu1  ;;  %1494 = vmatmul.mubr.f32.gmra.mrb[46].mxu0 %v1361_v58  ;;  %1639 = vmatmul.mubr.f32.gmra.mrb[46].mxu1 %v1363_v41  ;;  %v1365_v40 = vmul.f32 %v4377_v43, %v4377_v43  ;;  %v1367_v44 = vmul.f32 %v4379_v13, %v4379_v13 }
 0x2d5   : > { %v1366_v22 = vmul.f32 %v4381_v17, %v4381_v17  ;;  %v1368_v16 = vmul.f32 %v4383_v18, %v4383_v18  ;;  %3303 = vmatpush3.bf16.xpose.msk.msra.mxu0 %vm4009_vm2, %v3830_v0  ;;  %3351 = vmatpush3.bf16.xpose.msk.msra.mxu1 %vm4009_vm2, %v3834_v1 }
 0x2d6   : > { %3306 = vmatprep.subr.msk.bf16.mxu0 %vm4009_vm2, %v3836_v2  ;;  %3354 = vmatprep.subr.msk.bf16.mxu1 %vm4009_vm2, %v3848_v10 }
 0x2d7   : > { %v4405_v28 = vpop.f32.mrb[18].mxu0  ;;  %v4407_v0 = vpop.f32.mrb[18].mxu1  ;;  %1498 = vmatprep.mubr.f32.mxu0 %v1366_v22  ;;  %1643 = vmatprep.mubr.f32.mxu1 %v1368_v16 }
 0x2d8   : > { %v4409_v1 = vpop.f32.mrb[19].mxu0  ;;  %v4411_v46 = vpop.f32.mrb[19].mxu1  ;;  %1499 = vmatmul.mubr.f32.gmra.mrb[48].mxu0 %v1365_v40  ;;  %1644 = vmatmul.mubr.f32.gmra.mrb[48].mxu1 %v1367_v44  ;;  %v1369_v10 = vmul.f32 %v4405_v28, %v4405_v28  ;;  %v1371_v48 = vmul.f32 %v4407_v0, %v4407_v0 }
 0x2d9   : > { %v1370_v47 = vmul.f32 %v4409_v1, %v4409_v1  ;;  %v1372_v2 = vmul.f32 %v4411_v46, %v4411_v46 }
 0x2db   : > { %v4421_v57 = vpop.f32.mrb[20].mxu0  ;;  %v4423_v34 = vpop.f32.mrb[20].mxu1  ;;  %1503 = vmatprep.mubr.f32.mxu0 %v1370_v47  ;;  %1648 = vmatprep.mubr.f32.mxu1 %v1372_v2 }
 0x2dc   : > { %v4425_v54 = vpop.f32.mrb[21].mxu0  ;;  %v4427_v58 = vpop.f32.mrb[21].mxu1  ;;  %1504 = vmatmul.mubr.f32.gmra.mrb[50].mxu0 %v1369_v10  ;;  %1649 = vmatmul.mubr.f32.gmra.mrb[50].mxu1 %v1371_v48  ;;  %v1373_v16 = vmul.f32 %v4421_v57, %v4421_v57  ;;  %v1375_v40 = vmul.f32 %v4423_v34, %v4423_v34 }
 0x2dd   : > { %v1374_v41 = vmul.f32 %v4425_v54, %v4425_v54  ;;  %v1376_v22 = vmul.f32 %v4427_v58, %v4427_v58  ;;  %3309 = vmatpush3.bf16.xpose.msk.msra.mxu0 %vm4009_vm2, %v3866_v19  ;;  %3357 = vmatpush3.bf16.xpose.msk.msra.mxu1 %vm4009_vm2, %v3870_v20 }
 0x2de   : > { %3312 = vmatprep.subr.msk.bf16.mxu0 %vm4009_vm2, %v3872_v21  ;;  %3360 = vmatprep.subr.msk.bf16.mxu1 %vm4009_vm2, %v3884_v27 }
 0x2df   : > { %v4449_v44 = vpop.f32.mrb[22].mxu0  ;;  %v4451_v19 = vpop.f32.mrb[22].mxu1  ;;  %1508 = vmatprep.mubr.f32.mxu0 %v1374_v41  ;;  %1653 = vmatprep.mubr.f32.mxu1 %v1376_v22 }
 0x2e0   : > { %v4453_v20 = vpop.f32.mrb[23].mxu0  ;;  %v4455_v47 = vpop.f32.mrb[23].mxu1  ;;  %1509 = vmatmul.mubr.f32.gmra.mrb[52].mxu0 %v1373_v16  ;;  %1654 = vmatmul.mubr.f32.gmra.mrb[52].mxu1 %v1375_v40  ;;  %v1377_v27 = vmul.f32 %v4449_v44, %v4449_v44  ;;  %v1379_v10 = vmul.f32 %v4451_v19, %v4451_v19 }
 0x2e1   : > { %v1378_v2 = vmul.f32 %v4453_v20, %v4453_v20  ;;  %v1380_v21 = vmul.f32 %v4455_v47, %v4455_v47 }
 0x2e3   : > { %v4465_v48 = vpop.f32.mrb[24].mxu0  ;;  %v4467_v41 = vpop.f32.mrb[24].mxu1  ;;  %1513 = vmatprep.mubr.f32.mxu0 %v1378_v2  ;;  %1658 = vmatprep.mubr.f32.mxu1 %v1380_v21 }
 0x2e4   : > { %v4469_v22 = vpop.f32.mrb[25].mxu0  ;;  %v4471_v16 = vpop.f32.mrb[25].mxu1  ;;  %1514 = vmatmul.mubr.f32.gmra.mrb[54].mxu0 %v1377_v27  ;;  %1659 = vmatmul.mubr.f32.gmra.mrb[54].mxu1 %v1379_v10  ;;  %v1381_v2 = vmul.f32 %v4465_v48, %v4465_v48  ;;  %v1383_v21 = vmul.f32 %v4467_v41, %v4467_v41 }
 0x2e5   : > { %4843 = vst [vmem:[#allocation7_spill] sm:$0xff] %v4471_v16  ;;  %v1382_v40 = vmul.f32 %v4469_v22, %v4469_v22  ;;  %v1384_v50 = vmul.f32 %v4471_v16, %v4471_v16  ;;  %3315 = vmatpush3.bf16.xpose.msk.msra.mxu0 %vm4009_vm2, %v3902_v36  ;;  %3363 = vmatpush3.bf16.xpose.msk.msra.mxu1 %vm4009_vm2, %v3906_v37 }
 0x2e6   : > { %3318 = vmatprep.subr.msk.bf16.mxu0 %vm4009_vm2, %v3908_v38  ;;  %3366 = vmatprep.subr.msk.bf16.mxu1 %vm4009_vm2, %v3920_v45 }
 0x2e7   : > { %v4493_v27 = vpop.f32.mrb[26].mxu0  ;;  %v4495_v36 = vpop.f32.mrb[26].mxu1  ;;  %1518 = vmatprep.mubr.f32.mxu0 %v1382_v40  ;;  %1663 = vmatprep.mubr.f32.mxu1 %v1384_v50 }
 0x2e8   : > { %4844 = vst [vmem:[#allocation8_spill] sm:$0xff] %v4493_v27  ;;  %4845 = vst [vmem:[#allocation9_spill] sm:$0xff] %v4495_v36  ;;  %v4497_v37 = vpop.f32.mrb[27].mxu0  ;;  %v4499_v10 = vpop.f32.mrb[27].mxu1  ;;  %1519 = vmatmul.mubr.f32.gmra.mrb[56].mxu0 %v1381_v2  ;;  %1664 = vmatmul.mubr.f32.gmra.mrb[56].mxu1 %v1383_v21  ;;  %v1385_v45 = vmul.f32 %v4493_v27, %v4493_v27  ;;  %v1387_v16 = vmul.f32 %v4495_v36, %v4495_v36 }
 0x2e9   : > { %4846 = vst [vmem:[#allocation10_spill] sm:$0xff] %v4497_v37  ;;  %4847 = vst [vmem:[#allocation11_spill] sm:$0xff] %v4499_v10  ;;  %v1386_v49 = vmul.f32 %v4497_v37, %v4497_v37  ;;  %v1388_v38 = vmul.f32 %v4499_v10, %v4499_v10 }
 0x2eb   : > { %v4509_v40 = vpop.f32.mrb[28].mxu0  ;;  %v4511_v50 = vpop.f32.mrb[28].mxu1  ;;  %1523 = vmatprep.mubr.f32.mxu0 %v1386_v49  ;;  %1668 = vmatprep.mubr.f32.mxu1 %v1388_v38 }
 0x2ec   : > { %4848 = vst [vmem:[#allocation12_spill] sm:$0xff] %v4509_v40  ;;  %4849 = vst [vmem:[#allocation13_spill] sm:$0xff] %v4511_v50  ;;  %v4513_v2 = vpop.f32.mrb[29].mxu0  ;;  %v4515_v21 = vpop.f32.mrb[29].mxu1  ;;  %1524 = vmatmul.mubr.f32.gmra.mrb[58].mxu0 %v1385_v45  ;;  %1669 = vmatmul.mubr.f32.gmra.mrb[58].mxu1 %v1387_v16  ;;  %v1389_v49 = vmul.f32 %v4509_v40, %v4509_v40  ;;  %v1391_v16 = vmul.f32 %v4511_v50, %v4511_v50 }
 0x2ed   : > { %4850 = vst [vmem:[#allocation14_spill] sm:$0xff] %v4513_v2  ;;  %4851 = vst [vmem:[#allocation15_spill] sm:$0xff] %v4515_v21  ;;  %v1390_v10 = vmul.f32 %v4513_v2, %v4513_v2  ;;  %v1392_v37 = vmul.f32 %v4515_v21, %v4515_v21  ;;  %3321 = vmatpush3.bf16.xpose.msk.msra.mxu0 %vm4009_vm2, %v3938_v52  ;;  %3369 = vmatpush3.bf16.xpose.msk.msra.mxu1 %vm4009_vm2, %v3942_v55 }
 0x2ee   : > { %3324 = vmatprep.subr.msk.bf16.mxu0 %vm4009_vm2, %v3944_v56  ;;  %3372 = vmatprep.subr.msk.bf16.mxu1 %vm4009_vm2, %v3953_v60 }
 0x2ef   : > { %v4537_v38 = vpop.f32.mrb[30].mxu0  ;;  %v4539_v52 = vpop.f32.mrb[30].mxu1  ;;  %1528 = vmatprep.mubr.f32.mxu0 %v1390_v10  ;;  %1673 = vmatprep.mubr.f32.mxu1 %v1392_v37 }
 0x2f0   : > { %4852 = vst [vmem:[#allocation16_spill] sm:$0xff] %v4537_v38  ;;  %4853 = vst [vmem:[#allocation17_spill] sm:$0xff] %v4539_v52  ;;  %v4541_v55 = vpop.f32.mrb[31].mxu0  ;;  %v4543_v45 = vpop.f32.mrb[31].mxu1  ;;  %1529 = vmatmul.mubr.f32.gmra.mrb[60].mxu0 %v1389_v49  ;;  %1674 = vmatmul.mubr.f32.gmra.mrb[60].mxu1 %v1391_v16  ;;  %v1393_v60 = vmul.f32 %v4537_v38, %v4537_v38  ;;  %v1395_v2 = vmul.f32 %v4539_v52, %v4539_v52 }
 0x2f1   : > { %4854 = vst [vmem:[#allocation18_spill] sm:$0xff] %v4541_v55  ;;  %4855 = vst [vmem:[#allocation19_spill] sm:$0xff] %v4543_v45  ;;  %v1394_v21 = vmul.f32 %v4541_v55, %v4541_v55  ;;  %v1396_v56 = vmul.f32 %v4543_v45, %v4543_v45 }
 0x2f3   : > { %v4553_v10 = vpop.f32.mrb[32].mxu0  ;;  %v4555_v37 = vpop.f32.mrb[32].mxu1  ;;  %1533 = vmatprep.mubr.f32.mxu0 %v1394_v21  ;;  %1678 = vmatprep.mubr.f32.mxu1 %v1396_v56 }
 0x2f4   : > { %4856 = vst [vmem:[#allocation20_spill] sm:$0xff] %v4553_v10  ;;  %4857 = vst [vmem:[#allocation21_spill] sm:$0xff] %v4555_v37  ;;  %v4557_v49 = vpop.f32.mrb[33].mxu0  ;;  %v4559_v16 = vpop.f32.mrb[33].mxu1  ;;  %1534 = vmatmul.mubr.f32.gmra.mrb[62].mxu0 %v1393_v60  ;;  %1679 = vmatmul.mubr.f32.gmra.mrb[62].mxu1 %v1395_v2  ;;  %v1397_v21 = vmul.f32 %v4553_v10, %v4553_v10  ;;  %v1399_v2 = vmul.f32 %v4555_v37, %v4555_v37 }
 0x2f5   : > { %4858 = vst [vmem:[#allocation22_spill] sm:$0xff] %v4557_v49  ;;  %4859 = vst [vmem:[#allocation23_spill] sm:$0xff] %v4559_v16  ;;  %v1398_v45 = vmul.f32 %v4557_v49, %v4557_v49  ;;  %v1400_v55 = vmul.f32 %v4559_v16, %v4559_v16  ;;  %3327 = vmatpush3.bf16.xpose.msk.msra.mxu0 %vm4009_vm2, %v3962_v63  ;;  %3375 = vmatpush3.bf16.xpose.msk.msra.mxu1 %vm4009_vm2, %v3966_v4 }
 0x2f6   : > { %3330 = vmatprep.subr.msk.bf16.mxu0 %vm4009_vm2, %v3980_v12  ;;  %3378 = vmatprep.subr.msk.bf16.mxu1 %vm4009_vm2, %v3991_v23 }
 0x2f7   : > { %v4581_v56 = vpop.f32.mrb[34].mxu0  ;;  %v4583_v63 = vpop.f32.mrb[34].mxu1  ;;  %1538 = vmatprep.mubr.f32.mxu0 %v1398_v45  ;;  %1683 = vmatprep.mubr.f32.mxu1 %v1400_v55 }
 0x2f8   : > { %4860 = vst [vmem:[#allocation24_spill] sm:$0xff] %v4581_v56  ;;  %4861 = vst [vmem:[#allocation25_spill] sm:$0xff] %v4583_v63  ;;  %v4585_v4 = vpop.f32.mrb[35].mxu0  ;;  %v4587_v60 = vpop.f32.mrb[35].mxu1  ;;  %1539 = vmatmul.mubr.f32.gmra.mrb[64].mxu0 %v1397_v21  ;;  %1684 = vmatmul.mubr.f32.gmra.mrb[64].mxu1 %v1399_v2  ;;  %v1401_v23 = vmul.f32 %v4581_v56, %v4581_v56  ;;  %v1403_v49 = vmul.f32 %v4583_v63, %v4583_v63 }
 0x2f9   : > { %4862 = vst [vmem:[#allocation26_spill] sm:$0xff] %v4585_v4  ;;  %4863 = vst [vmem:[#allocation27_spill] sm:$0xff] %v4587_v60  ;;  %v1402_v16 = vmul.f32 %v4585_v4, %v4585_v4  ;;  %v1404_v12 = vmul.f32 %v4587_v60, %v4587_v60 }
 0x2fb   : > { %v4597_v45 = vpop.f32.mrb[36].mxu0  ;;  %v4599_v55 = vpop.f32.mrb[36].mxu1  ;;  %1543 = vmatprep.mubr.f32.mxu0 %v1402_v16  ;;  %1688 = vmatprep.mubr.f32.mxu1 %v1404_v12 }
 0x2fc   : > { %4864 = vst [vmem:[#allocation28_spill] sm:$0xff] %v4597_v45  ;;  %4865 = vst [vmem:[#allocation29_spill] sm:$0xff] %v4599_v55  ;;  %v4601_v21 = vpop.f32.mrb[37].mxu0  ;;  %v4603_v2 = vpop.f32.mrb[37].mxu1  ;;  %1544 = vmatmul.mubr.f32.gmra.mrb[66].mxu0 %v1401_v23  ;;  %1689 = vmatmul.mubr.f32.gmra.mrb[66].mxu1 %v1403_v49  ;;  %v1405_v16 = vmul.f32 %v4597_v45, %v4597_v45  ;;  %v1407_v49 = vmul.f32 %v4599_v55, %v4599_v55 }
 0x2fd   : > { %4866 = vst [vmem:[#allocation30_spill] sm:$0xff] %v4601_v21  ;;  %4867 = vst [vmem:[#allocation31_spill] sm:$0xff] %v4603_v2  ;;  %v1406_v60 = vmul.f32 %v4601_v21, %v4601_v21  ;;  %v1408_v4 = vmul.f32 %v4603_v2, %v4603_v2  ;;  %3333 = vmatpush3.bf16.xpose.msk.msra.mxu0 %vm4009_vm2, %v3993_v24  ;;  %3381 = vmatpush3.bf16.xpose.msk.msra.mxu1 %vm4009_vm2, %v4002_v30 }
 0x2ff   : > { %1548 = vmatprep.mubr.f32.mxu0 %v1406_v60  ;;  %1693 = vmatprep.mubr.f32.mxu1 %v1408_v4 }
 0x300   : > { %1549 = vmatmul.mubr.f32.gmra.mrb[68].mxu0 %v1405_v16  ;;  %1694 = vmatmul.mubr.f32.gmra.mrb[68].mxu1 %v1407_v49 }
 0x397   : > { %v2774_v12 = vpop.f32.mrb[38].mxu0  ;;  %v2854_v23 = vpop.f32.mrb[38].mxu1 }
 0x398   : > { %v2775_v2 = vpop.f32.mrb[39].mxu0  ;;  %v2855_v21 = vpop.f32.mrb[39].mxu1 }
 0x399   : > { %v2776_v63 = vadd.f32 %v2775_v2, %v2774_v12  ;;  %v2856_v24 = vadd.f32 %v2855_v21, %v2854_v23 }
 0x39b   : > { %v1621_v56 = vadd.f32 %v2856_v24, %v2776_v63  ;;  %v2777_v37 = vpop.f32.mrb[40].mxu0  ;;  %v2857_v32 = vpop.f32.mrb[40].mxu1 }
 0x39c   : > { %v2778_v30 = vpop.f32.mrb[41].mxu0  ;;  %v2858_v10 = vpop.f32.mrb[41].mxu1 }
 0x39d   : > { %v1699_v52 = vmax.f32 %v1621_v56, 1e-24  ;;  %v2779_v45 = vadd.f32 %v2778_v30, %v2777_v37  ;;  %v2859_v38 = vadd.f32 %v2858_v10, %v2857_v32 }
 0x39f   : > { %3441 = vrsqrt.f32 %v1699_v52  ;;  %v1626_v55 = vadd.f32 %v2859_v38, %v2779_v45  ;;  %v2780_v60 = vpop.f32.mrb[42].mxu0  ;;  %v2860_v4 = vpop.f32.mrb[42].mxu1 }
 0x3a0   : > { %v2781_v16 = vpop.f32.mrb[43].mxu0  ;;  %v2861_v49 = vpop.f32.mrb[43].mxu1 }
 0x3a1   : > { %v1700_v50 = vmax.f32 %v1626_v55, 1e-24  ;;  %v2782_v40 = vadd.f32 %v2781_v16, %v2780_v60  ;;  %v2862_v36 = vadd.f32 %v2861_v49, %v2860_v4 }
 0x3a3   : > { %3443 = vrsqrt.f32 %v1700_v50  ;;  %v1631_v2 = vadd.f32 %v2862_v36, %v2782_v40  ;;  %v2783_v21 = vpop.f32.mrb[44].mxu0  ;;  %v2863_v63 = vpop.f32.mrb[44].mxu1 }
 0x3a4   : > { %v2784_v12 = vpop.f32.mrb[45].mxu0  ;;  %v2864_v23 = vpop.f32.mrb[45].mxu1 }
 0x3a5   : > { %v1701_v24 = vmax.f32 %v1631_v2, 1e-24  ;;  %v2785_v27 = vadd.f32 %v2784_v12, %v2783_v21  ;;  %v2865_v56 = vadd.f32 %v2864_v23, %v2863_v63 }
 0x3a7   : > { %3445 = vrsqrt.f32 %v1701_v24  ;;  %v1636_v10 = vadd.f32 %v2865_v56, %v2785_v27  ;;  %v2786_v52 = vpop.f32.mrb[46].mxu0  ;;  %v2866_v38 = vpop.f32.mrb[46].mxu1 }
 0x3a8   : > { %v2787_v37 = vpop.f32.mrb[47].mxu0  ;;  %v2867_v45 = vpop.f32.mrb[47].mxu1 }
 0x3a9   : > { %v3442_v32 = vpop.eup %3441  ;;  %v1702_v30 = vmax.f32 %v1636_v10, 1e-24  ;;  %v2788_v55 = vadd.f32 %v2787_v37, %v2786_v52  ;;  %v2868_v60 = vadd.f32 %v2867_v45, %v2866_v38 }
 0x3aa   : > { %v1731_v4 = vmul.f32 0.25, %v3442_v32 }
 0x3ab   : > { %3447 = vrsqrt.f32 %v1702_v30  ;;  %v1641_v36 = vadd.f32 %v2868_v60, %v2788_v55  ;;  %v2789_v40 = vpop.f32.mrb[48].mxu0  ;;  %v2869_v50 = vpop.f32.mrb[48].mxu1 }
 0x3ac   : > { %v2790_v16 = vpop.f32.mrb[49].mxu0  ;;  %v2870_v49 = vpop.f32.mrb[49].mxu1  ;;  %2934 = vmatprep.mubr.msk.f32.mxu0 %vm613_vm1, %v1731_v4  ;;  %2998 = vmatprep.mubr.msk.f32.mxu1 %vm613_vm1, %v1731_v4 }
 0x3ad   : > { %v3444_v27 = vpop.eup %3443  ;;  %v1703_v2 = vmax.f32 %v1641_v36, 1e-24  ;;  %v2791_v21 = vadd.f32 %v2790_v16, %v2789_v40  ;;  %v2871_v63 = vadd.f32 %v2870_v49, %v2869_v50  ;;  %2935 = vmatmul.mubr.msk.f32.vlgmr.msra.gmra.mrb[70].mxu0 %vm613_vm1, %v1731_v4  ;;  %2999 = vmatmul.mubr.msk.f32.vlgmr.msra.gmra.mrb[70].mxu1 %vm613_vm1, %v1731_v4 }
 0x3ae   : > { %v1732_v12 = vmul.f32 0.25, %v3444_v27 }
 0x3af   : > { %3449 = vrsqrt.f32 %v1703_v2  ;;  %v1646_v23 = vadd.f32 %v2871_v63, %v2791_v21  ;;  %v2792_v24 = vpop.f32.mrb[50].mxu0  ;;  %v2872_v56 = vpop.f32.mrb[50].mxu1 }
 0x3b0   : > { %v2793_v10 = vpop.f32.mrb[51].mxu0  ;;  %v2873_v52 = vpop.f32.mrb[51].mxu1  ;;  %2936 = vmatprep.mubr.msk.f32.mxu0 %vm613_vm1, %v1732_v12  ;;  %3000 = vmatprep.mubr.msk.f32.mxu1 %vm613_vm1, %v1732_v12 }
 0x3b1   : > { %v3446_v38 = vpop.eup %3445  ;;  %v1704_v37 = vmax.f32 %v1646_v23, 1e-24  ;;  %v2794_v45 = vadd.f32 %v2793_v10, %v2792_v24  ;;  %v2874_v32 = vadd.f32 %v2873_v52, %v2872_v56  ;;  %2937 = vmatmul.mubr.msk.f32.gmra.mrb[72].mxu0 %vm613_vm1, %v1732_v12  ;;  %3001 = vmatmul.mubr.msk.f32.gmra.mrb[72].mxu1 %vm613_vm1, %v1732_v12 }
 0x3b2   : > { %v1733_v30 = vmul.f32 0.25, %v3446_v38 }
 0x3b3   : > { %3451 = vrsqrt.f32 %v1704_v37  ;;  %v1651_v55 = vadd.f32 %v2874_v32, %v2794_v45  ;;  %v2795_v60 = vpop.f32.mrb[52].mxu0  ;;  %v2875_v4 = vpop.f32.mrb[52].mxu1 }
 0x3b4   : > { %v2796_v36 = vpop.f32.mrb[53].mxu0  ;;  %v2876_v40 = vpop.f32.mrb[53].mxu1  ;;  %2938 = vmatprep.mubr.msk.f32.mxu0 %vm613_vm1, %v1733_v30  ;;  %3002 = vmatprep.mubr.msk.f32.mxu1 %vm613_vm1, %v1733_v30 }
 0x3b5   : > { %v3448_v50 = vpop.eup %3447  ;;  %v1705_v16 = vmax.f32 %v1651_v55, 1e-24  ;;  %v2797_v49 = vadd.f32 %v2796_v36, %v2795_v60  ;;  %v2877_v27 = vadd.f32 %v2876_v40, %v2875_v4  ;;  %2939 = vmatmul.mubr.msk.f32.gmra.mrb[74].mxu0 %vm613_vm1, %v1733_v30  ;;  %3003 = vmatmul.mubr.msk.f32.gmra.mrb[74].mxu1 %vm613_vm1, %v1733_v30 }
 0x3b6   : > { %v1734_v2 = vmul.f32 0.25, %v3448_v50 }
 0x3b7   : > { %3453 = vrsqrt.f32 %v1705_v16  ;;  %v1656_v21 = vadd.f32 %v2877_v27, %v2797_v49  ;;  %v2798_v63 = vpop.f32.mrb[54].mxu0  ;;  %v2878_v12 = vpop.f32.mrb[54].mxu1 }
 0x3b8   : > { %v2799_v23 = vpop.f32.mrb[55].mxu0  ;;  %v2879_v24 = vpop.f32.mrb[55].mxu1  ;;  %2940 = vmatprep.mubr.msk.f32.mxu0 %vm613_vm1, %v1734_v2  ;;  %3004 = vmatprep.mubr.msk.f32.mxu1 %vm613_vm1, %v1734_v2 }
 0x3b9   : > { %v3450_v56 = vpop.eup %3449  ;;  %v1706_v10 = vmax.f32 %v1656_v21, 1e-24  ;;  %v2800_v52 = vadd.f32 %v2799_v23, %v2798_v63  ;;  %v2880_v38 = vadd.f32 %v2879_v24, %v2878_v12  ;;  %2941 = vmatmul.mubr.msk.f32.gmra.mrb[76].mxu0 %vm613_vm1, %v1734_v2  ;;  %3005 = vmatmul.mubr.msk.f32.gmra.mrb[76].mxu1 %vm613_vm1, %v1734_v2 }
 0x3ba   : > { %v1735_v37 = vmul.f32 0.25, %v3450_v56 }
 0x3bb   : > { %3455 = vrsqrt.f32 %v1706_v10  ;;  %v1661_v45 = vadd.f32 %v2880_v38, %v2800_v52  ;;  %v2801_v32 = vpop.f32.mrb[56].mxu0  ;;  %v2881_v30 = vpop.f32.mrb[56].mxu1 }
 0x3bc   : > { %v2802_v55 = vpop.f32.mrb[57].mxu0  ;;  %v2882_v60 = vpop.f32.mrb[57].mxu1  ;;  %2942 = vmatprep.mubr.msk.f32.mxu0 %vm613_vm1, %v1735_v37  ;;  %3006 = vmatprep.mubr.msk.f32.mxu1 %vm613_vm1, %v1735_v37 }
 0x3bd   : > { %v3452_v4 = vpop.eup %3451  ;;  %v1707_v36 = vmax.f32 %v1661_v45, 1e-24  ;;  %v2803_v40 = vadd.f32 %v2802_v55, %v2801_v32  ;;  %v2883_v50 = vadd.f32 %v2882_v60, %v2881_v30  ;;  %2943 = vmatmul.mubr.msk.f32.gmra.mrb[78].mxu0 %vm613_vm1, %v1735_v37  ;;  %3007 = vmatmul.mubr.msk.f32.gmra.mrb[78].mxu1 %vm613_vm1, %v1735_v37 }
 0x3be   : > { %v1736_v16 = vmul.f32 0.25, %v3452_v4 }
 0x3bf   : > { %3457 = vrsqrt.f32 %v1707_v36  ;;  %v1666_v49 = vadd.f32 %v2883_v50, %v2803_v40  ;;  %v2804_v27 = vpop.f32.mrb[58].mxu0  ;;  %v2884_v2 = vpop.f32.mrb[58].mxu1 }
 0x3c0   : > { %v2805_v21 = vpop.f32.mrb[59].mxu0  ;;  %v2885_v63 = vpop.f32.mrb[59].mxu1  ;;  %2944 = vmatprep.mubr.msk.f32.mxu0 %vm613_vm1, %v1736_v16  ;;  %3008 = vmatprep.mubr.msk.f32.mxu1 %vm613_vm1, %v1736_v16 }
 0x3c1   : > { %v3454_v12 = vpop.eup %3453  ;;  %v1708_v23 = vmax.f32 %v1666_v49, 1e-24  ;;  %v2806_v24 = vadd.f32 %v2805_v21, %v2804_v27  ;;  %v2886_v56 = vadd.f32 %v2885_v63, %v2884_v2  ;;  %2945 = vmatmul.mubr.msk.f32.gmra.mrb[80].mxu0 %vm613_vm1, %v1736_v16  ;;  %3009 = vmatmul.mubr.msk.f32.gmra.mrb[80].mxu1 %vm613_vm1, %v1736_v16 }
 0x3c2   : > { %v1737_v10 = vmul.f32 0.25, %v3454_v12 }
 0x3c3   : > { %3459 = vrsqrt.f32 %v1708_v23  ;;  %v1671_v52 = vadd.f32 %v2886_v56, %v2806_v24  ;;  %v2807_v38 = vpop.f32.mrb[60].mxu0  ;;  %v2887_v37 = vpop.f32.mrb[60].mxu1 }
 0x3c4   : > { %v2808_v45 = vpop.f32.mrb[61].mxu0  ;;  %v2888_v32 = vpop.f32.mrb[61].mxu1  ;;  %2946 = vmatprep.mubr.msk.f32.mxu0 %vm613_vm1, %v1737_v10  ;;  %3010 = vmatprep.mubr.msk.f32.mxu1 %vm613_vm1, %v1737_v10 }
 0x3c5   : > { %v3456_v30 = vpop.eup %3455  ;;  %v1709_v55 = vmax.f32 %v1671_v52, 1e-24  ;;  %v2809_v60 = vadd.f32 %v2808_v45, %v2807_v38  ;;  %v2889_v4 = vadd.f32 %v2888_v32, %v2887_v37  ;;  %2947 = vmatmul.mubr.msk.f32.gmra.mrb[82].mxu0 %vm613_vm1, %v1737_v10  ;;  %3011 = vmatmul.mubr.msk.f32.gmra.mrb[82].mxu1 %vm613_vm1, %v1737_v10 }
 0x3c6   : > { %v1738_v36 = vmul.f32 0.25, %v3456_v30 }
 0x3c7   : > { %3461 = vrsqrt.f32 %v1709_v55  ;;  %v1676_v40 = vadd.f32 %v2889_v4, %v2809_v60  ;;  %v2810_v50 = vpop.f32.mrb[62].mxu0  ;;  %v2890_v16 = vpop.f32.mrb[62].mxu1 }
 0x3c8   : > { %v2811_v49 = vpop.f32.mrb[63].mxu0  ;;  %v2891_v27 = vpop.f32.mrb[63].mxu1  ;;  %2948 = vmatprep.mubr.msk.f32.mxu0 %vm613_vm1, %v1738_v36  ;;  %3012 = vmatprep.mubr.msk.f32.mxu1 %vm613_vm1, %v1738_v36 }
 0x3c9   : > { %v3458_v2 = vpop.eup %3457  ;;  %v1710_v21 = vmax.f32 %v1676_v40, 1e-24  ;;  %v2812_v63 = vadd.f32 %v2811_v49, %v2810_v50  ;;  %v2892_v12 = vadd.f32 %v2891_v27, %v2890_v16  ;;  %2949 = vmatmul.mubr.msk.f32.gmra.mrb[84].mxu0 %vm613_vm1, %v1738_v36  ;;  %3013 = vmatmul.mubr.msk.f32.gmra.mrb[84].mxu1 %vm613_vm1, %v1738_v36 }
 0x3ca   : > { %v1739_v23 = vmul.f32 0.25, %v3458_v2 }
 0x3cb   : > { %3463 = vrsqrt.f32 %v1710_v21  ;;  %v1681_v24 = vadd.f32 %v2892_v12, %v2812_v63  ;;  %v2813_v56 = vpop.f32.mrb[64].mxu0  ;;  %v2893_v10 = vpop.f32.mrb[64].mxu1 }
 0x3cc   : > { %v2814_v52 = vpop.f32.mrb[65].mxu0  ;;  %v2894_v38 = vpop.f32.mrb[65].mxu1  ;;  %2950 = vmatprep.mubr.msk.f32.mxu0 %vm613_vm1, %v1739_v23  ;;  %3014 = vmatprep.mubr.msk.f32.mxu1 %vm613_vm1, %v1739_v23 }
 0x3cd   : > { %v3460_v37 = vpop.eup %3459  ;;  %v1711_v45 = vmax.f32 %v1681_v24, 1e-24  ;;  %v2815_v32 = vadd.f32 %v2814_v52, %v2813_v56  ;;  %v2895_v30 = vadd.f32 %v2894_v38, %v2893_v10  ;;  %2951 = vmatmul.mubr.msk.f32.gmra.mrb[86].mxu0 %vm613_vm1, %v1739_v23  ;;  %3015 = vmatmul.mubr.msk.f32.gmra.mrb[86].mxu1 %vm613_vm1, %v1739_v23 }
 0x3ce   : > { %v1740_v55 = vmul.f32 0.25, %v3460_v37 }
 0x3cf   : > { %3465 = vrsqrt.f32 %v1711_v45  ;;  %v1686_v60 = vadd.f32 %v2895_v30, %v2815_v32  ;;  %v2816_v4 = vpop.f32.mrb[66].mxu0  ;;  %v2896_v36 = vpop.f32.mrb[66].mxu1 }
 0x3d0   : > { %v2817_v40 = vpop.f32.mrb[67].mxu0  ;;  %v2897_v50 = vpop.f32.mrb[67].mxu1  ;;  %2952 = vmatprep.mubr.msk.f32.mxu0 %vm613_vm1, %v1740_v55  ;;  %3016 = vmatprep.mubr.msk.f32.mxu1 %vm613_vm1, %v1740_v55 }
 0x3d1   : > { %v3462_v16 = vpop.eup %3461  ;;  %v1712_v49 = vmax.f32 %v1686_v60, 1e-24  ;;  %v2818_v27 = vadd.f32 %v2817_v40, %v2816_v4  ;;  %v2898_v2 = vadd.f32 %v2897_v50, %v2896_v36  ;;  %2953 = vmatmul.mubr.msk.f32.gmra.mrb[88].mxu0 %vm613_vm1, %v1740_v55  ;;  %3017 = vmatmul.mubr.msk.f32.gmra.mrb[88].mxu1 %vm613_vm1, %v1740_v55 }
 0x3d2   : > { %v1741_v21 = vmul.f32 0.25, %v3462_v16 }
 0x3d3   : > { %3467 = vrsqrt.f32 %v1712_v49  ;;  %v1691_v63 = vadd.f32 %v2898_v2, %v2818_v27  ;;  %v2819_v12 = vpop.f32.mrb[68].mxu0  ;;  %v2899_v23 = vpop.f32.mrb[68].mxu1  ;;  %v956_v27 = vpack.c.bf16 %v4268_v61, %v4268_v61  ;;  %v958_v2 = vpack.c.bf16 %v4271_v7, %v4271_v7 }
 0x3d4   : > { %v2820_v24 = vpop.f32.mrb[69].mxu0  ;;  %v2900_v56 = vpop.f32.mrb[69].mxu1  ;;  %2954 = vmatprep.mubr.msk.f32.mxu0 %vm613_vm1, %v1741_v21  ;;  %3018 = vmatprep.mubr.msk.f32.mxu1 %vm613_vm1, %v1741_v21 }
 0x3d5   : > { %v3464_v10 = vpop.eup %3463  ;;  %v1713_v52 = vmax.f32 %v1691_v63, 1e-24  ;;  %v2821_v38 = vadd.f32 %v2820_v24, %v2819_v12  ;;  %v2901_v37 = vadd.f32 %v2900_v56, %v2899_v23  ;;  %2955 = vmatmul.mubr.msk.f32.gmra.mrb[90].mxu0 %vm613_vm1, %v1741_v21  ;;  %3019 = vmatmul.mubr.msk.f32.gmra.mrb[90].mxu1 %vm613_vm1, %v1741_v21 }
 0x3d6   : > { %v1742_v45 = vmul.f32 0.25, %v3464_v10 }
 0x3d7   : > { %3469 = vrsqrt.f32 %v1713_v52  ;;  %v1696_v32 = vadd.f32 %v2901_v37, %v2821_v38 }
 0x3d8   : > { %2956 = vmatprep.mubr.msk.f32.mxu0 %vm613_vm1, %v1742_v45  ;;  %3020 = vmatprep.mubr.msk.f32.mxu1 %vm613_vm1, %v1742_v45 }
 0x3d9   : > { %v3466_v30 = vpop.eup %3465  ;;  %v1714_v55 = vmax.f32 %v1696_v32, 1e-24  ;;  %2957 = vmatmul.mubr.msk.f32.gmra.mrb[92].mxu0 %vm613_vm1, %v1742_v45  ;;  %3021 = vmatmul.mubr.msk.f32.gmra.mrb[92].mxu1 %vm613_vm1, %v1742_v45 }
 0x3da   : > { %v1743_v60 = vmul.f32 0.25, %v3466_v30 }
 0x3db   : > { %3471 = vrsqrt.f32 %v1714_v55 }
 0x3dc   : > { %2958 = vmatprep.mubr.msk.f32.mxu0 %vm613_vm1, %v1743_v60  ;;  %3022 = vmatprep.mubr.msk.f32.mxu1 %vm613_vm1, %v1743_v60 }
 0x3dd   : > { %v3468_v4 = vpop.eup %3467  ;;  %2959 = vmatmul.mubr.msk.f32.gmra.mrb[94].mxu0 %vm613_vm1, %v1743_v60  ;;  %3023 = vmatmul.mubr.msk.f32.gmra.mrb[94].mxu1 %vm613_vm1, %v1743_v60 }
 0x3de   : > { %v1744_v36 = vmul.f32 0.25, %v3468_v4 }
 0x3e0   : > { %2960 = vmatprep.mubr.msk.f32.mxu0 %vm613_vm1, %v1744_v36  ;;  %3024 = vmatprep.mubr.msk.f32.mxu1 %vm613_vm1, %v1744_v36 }
 0x3e1   : > { %v3470_v40 = vpop.eup %3469  ;;  %2961 = vmatmul.mubr.msk.f32.gmra.mrb[96].mxu0 %vm613_vm1, %v1744_v36  ;;  %3025 = vmatmul.mubr.msk.f32.gmra.mrb[96].mxu1 %vm613_vm1, %v1744_v36 }
 0x3e2   : > { %v1745_v50 = vmul.f32 0.25, %v3470_v40 }
 0x3e4   : > { %2962 = vmatprep.mubr.msk.f32.mxu0 %vm613_vm1, %v1745_v50  ;;  %3026 = vmatprep.mubr.msk.f32.mxu1 %vm613_vm1, %v1745_v50 }
 0x3e5   : > { %v3472_v16 = vpop.eup %3471  ;;  %2963 = vmatmul.mubr.msk.f32.gmra.mrb[98].mxu0 %vm613_vm1, %v1745_v50  ;;  %3027 = vmatmul.mubr.msk.f32.gmra.mrb[98].mxu1 %vm613_vm1, %v1745_v50 }
 0x3e6   : > { %v1746_v49 = vmul.f32 0.25, %v3472_v16 }
 0x3e8   : > { %2964 = vmatprep.mubr.msk.f32.mxu0 %vm613_vm1, %v1746_v49  ;;  %3028 = vmatprep.mubr.msk.f32.mxu1 %vm613_vm1, %v1746_v49 }
 0x3e9   : > { %2965 = vmatmul.mubr.msk.f32.gmra.mrb[100].mxu0 %vm613_vm1, %v1746_v49  ;;  %3029 = vmatmul.mubr.msk.f32.gmra.mrb[100].mxu1 %vm613_vm1, %v1746_v49 }
 0x3ea   : > { %2245 = vmatprep.mubr.bf16.mxu1 %v956_v27  ;;  %2285 = vmatprep.mubr.bf16.mxu0 %v958_v2 }
 0x480   : > { %v1861_v21 = vpop.f32.mrb[70].mxu0  ;;  %v2022_v63 = vpop.f32.mrb[70].mxu1 }
 0x481   : > { %v2117_v12 = vmul.f32 %v1861_v21, %v4273_v62  ;;  %v2119_v23 = vmul.f32 %v2022_v63, %v4275_v5  ;;  %v1863_v61 = vpop.f32.mrb[71].mxu0  ;;  %v2024_v24 = vpop.f32.mrb[71].mxu1 }
 0x482   : > { %v2118_v7 = vmul.f32 %v1863_v61, %v4277_v6  ;;  %v2120_v56 = vmul.f32 %v2024_v24, %v4279_v11 }
 0x484   : > { %v1867_v10 = vpop.f32.mrb[72].mxu0  ;;  %v2028_v52 = vpop.f32.mrb[72].mxu1 }
 0x485   : > { %v2121_v38 = vmul.f32 %v1867_v10, %v4289_v14  ;;  %v2123_v37 = vmul.f32 %v2028_v52, %v4291_v3  ;;  %v1869_v45 = vpop.f32.mrb[73].mxu0  ;;  %v2030_v32 = vpop.f32.mrb[73].mxu1 }
 0x486   : > { %v2122_v30 = vmul.f32 %v1869_v45, %v4293_v8  ;;  %v2124_v62 = vmul.f32 %v2030_v32, %v4295_v9 }
 0x487   : > { %v2181_v55 = vpack.c.bf16 %v2121_v38, %v2117_v12  ;;  %v2183_v5 = vpack.c.bf16 %v2123_v37, %v2119_v23 }
 0x488   : > { %v2182_v60 = vpack.c.bf16 %v2122_v30, %v2118_v7  ;;  %v2184_v4 = vpack.c.bf16 %v2124_v62, %v2120_v56  ;;  %v1873_v36 = vpop.f32.mrb[74].mxu0  ;;  %v2034_v6 = vpop.f32.mrb[74].mxu1 }
 0x489   : > { %v2125_v11 = vmul.f32 %v1873_v36, %v4317_v26  ;;  %v2127_v40 = vmul.f32 %v2034_v6, %v4319_v35  ;;  %v1875_v50 = vpop.f32.mrb[75].mxu0  ;;  %v2036_v14 = vpop.f32.mrb[75].mxu1 }
 0x48a   : > { %v2126_v3 = vmul.f32 %v1875_v50, %v4321_v39  ;;  %v2128_v16 = vmul.f32 %v2036_v14, %v4323_v15  ;;  %2213 = vmatprep.subr.bf16.mxu1 %v2182_v60  ;;  %2253 = vmatprep.subr.bf16.mxu0 %v2184_v4 }
 0x48b   : > { %2214 = vmatpush1.bf16.xpose.msra.mxu1 %v2181_v55  ;;  %2254 = vmatpush1.bf16.xpose.msra.mxu0 %v2183_v5 }
 0x48c   : > { %v1879_v8 = vpop.f32.mrb[76].mxu0  ;;  %v2040_v9 = vpop.f32.mrb[76].mxu1 }
 0x48d   : > { %v2129_v49 = vmul.f32 %v1879_v8, %v4333_v31  ;;  %v2131_v27 = vmul.f32 %v2040_v9, %v4335_v25  ;;  %v1881_v2 = vpop.f32.mrb[77].mxu0  ;;  %v2042_v26 = vpop.f32.mrb[77].mxu1 }
 0x48e   : > { %v2130_v35 = vmul.f32 %v1881_v2, %v4337_v29  ;;  %v2132_v21 = vmul.f32 %v2042_v26, %v4339_v42 }
 0x48f   : > { %v2185_v63 = vpack.c.bf16 %v2129_v49, %v2125_v11  ;;  %v2187_v39 = vpack.c.bf16 %v2131_v27, %v2127_v40 }
 0x490   : > { %v2186_v12 = vpack.c.bf16 %v2130_v35, %v2126_v3  ;;  %v2188_v15 = vpack.c.bf16 %v2132_v21, %v2128_v16  ;;  %v1885_v23 = vpop.f32.mrb[78].mxu0  ;;  %v2046_v61 = vpop.f32.mrb[78].mxu1 }
 0x491   : > { %v2133_v24 = vmul.f32 %v1885_v23, %v4361_v59  ;;  %v2135_v7 = vmul.f32 %v2046_v61, %v4363_v51  ;;  %v1887_v56 = vpop.f32.mrb[79].mxu0  ;;  %v2048_v31 = vpop.f32.mrb[79].mxu1 }
 0x492   : > { %v2134_v25 = vmul.f32 %v1887_v56, %v4365_v53  ;;  %v2136_v10 = vmul.f32 %v2048_v31, %v4367_v33  ;;  %2215 = vmatprep.subr.bf16.mxu1 %v2186_v12  ;;  %2255 = vmatprep.subr.bf16.mxu0 %v2188_v15  ;;  %v4870_v56 = vld [vmem:[#allocation9_spill] sm:$0xff] }
 0x493   : > { %2216 = vmatpush1.bf16.xpose.msra.mxu1 %v2185_v63  ;;  %2256 = vmatpush1.bf16.xpose.msra.mxu0 %v2187_v39  ;;  %v4868_v63 = vld [vmem:[#allocation7_spill] sm:$0xff] }
 0x494   : > { %v1891_v29 = vpop.f32.mrb[80].mxu0  ;;  %v2052_v42 = vpop.f32.mrb[80].mxu1 }
 0x495   : > { %v2137_v52 = vmul.f32 %v1891_v29, %v4377_v43  ;;  %v2139_v38 = vmul.f32 %v2052_v42, %v4379_v13  ;;  %v1893_v37 = vpop.f32.mrb[81].mxu0  ;;  %v2054_v59 = vpop.f32.mrb[81].mxu1  ;;  %v4872_v29 = vld [vmem:[#allocation11_spill] sm:$0xff] }
 0x496   : > { %v2138_v51 = vmul.f32 %v1893_v37, %v4381_v17  ;;  %v2140_v45 = vmul.f32 %v2054_v59, %v4383_v18  ;;  %v4874_v59 = vld [vmem:[#allocation13_spill] sm:$0xff] }
 0x497   : > { %v2189_v32 = vpack.c.bf16 %v2137_v52, %v2133_v24  ;;  %v2191_v53 = vpack.c.bf16 %v2139_v38, %v2135_v7  ;;  %v4869_v24 = vld [vmem:[#allocation8_spill] sm:$0xff] }
 0x498   : > { %v2190_v30 = vpack.c.bf16 %v2138_v51, %v2134_v25  ;;  %v2192_v33 = vpack.c.bf16 %v2140_v45, %v2136_v10  ;;  %v1897_v62 = vpop.f32.mrb[82].mxu0  ;;  %v2058_v55 = vpop.f32.mrb[82].mxu1  ;;  %v4871_v10 = vld [vmem:[#allocation10_spill] sm:$0xff]  ;;  %v4873_v38 = vld [vmem:[#allocation12_spill] sm:$0xff] }
 0x499   : > { %v2141_v5 = vmul.f32 %v1897_v62, %v4405_v28  ;;  %v2143_v60 = vmul.f32 %v2058_v55, %v4407_v0  ;;  %v1899_v4 = vpop.f32.mrb[83].mxu0  ;;  %v2060_v43 = vpop.f32.mrb[83].mxu1 }
 0x49a   : > { %v2142_v13 = vmul.f32 %v1899_v4, %v4409_v1  ;;  %v2144_v36 = vmul.f32 %v2060_v43, %v4411_v46  ;;  %2217 = vmatprep.subr.bf16.mxu1 %v2190_v30  ;;  %2257 = vmatprep.subr.bf16.mxu0 %v2192_v33  ;;  %v4876_v33 = vld [vmem:[#allocation15_spill] sm:$0xff] }
 0x49b   : > { %2218 = vmatpush1.bf16.xpose.msra.mxu1 %v2189_v32  ;;  %2258 = vmatpush1.bf16.xpose.msra.mxu0 %v2191_v53  ;;  %v4875_v53 = vld [vmem:[#allocation14_spill] sm:$0xff] }
 0x49c   : > { %v1903_v17 = vpop.f32.mrb[84].mxu0  ;;  %v2064_v18 = vpop.f32.mrb[84].mxu1 }
 0x49d   : > { %v2145_v6 = vmul.f32 %v1903_v17, %v4421_v57  ;;  %v2147_v11 = vmul.f32 %v2064_v18, %v4423_v34  ;;  %v1905_v40 = vpop.f32.mrb[85].mxu0  ;;  %v2066_v28 = vpop.f32.mrb[85].mxu1  ;;  %v4878_v18 = vld [vmem:[#allocation17_spill] sm:$0xff] }
 0x49e   : > { %v2146_v0 = vmul.f32 %v1905_v40, %v4425_v54  ;;  %v2148_v50 = vmul.f32 %v2066_v28, %v4427_v58  ;;  %v4879_v28 = vld [vmem:[#allocation18_spill] sm:$0xff] }
 0x49f   : > { %v2193_v14 = vpack.c.bf16 %v2145_v6, %v2141_v5  ;;  %v2195_v1 = vpack.c.bf16 %v2147_v11, %v2143_v60 }
 0x4a0   : > { %v2194_v3 = vpack.c.bf16 %v2146_v0, %v2142_v13  ;;  %v2196_v46 = vpack.c.bf16 %v2148_v50, %v2144_v36  ;;  %v1909_v16 = vpop.f32.mrb[86].mxu0  ;;  %v2070_v8 = vpop.f32.mrb[86].mxu1  ;;  %v4877_v36 = vld [vmem:[#allocation16_spill] sm:$0xff]  ;;  %v4880_v50 = vld [vmem:[#allocation19_spill] sm:$0xff] }
 0x4a1   : > { %v2149_v9 = vmul.f32 %v1909_v16, %v4449_v44  ;;  %v2151_v49 = vmul.f32 %v2070_v8, %v4451_v19  ;;  %v1911_v27 = vpop.f32.mrb[87].mxu0  ;;  %v2072_v57 = vpop.f32.mrb[87].mxu1  ;;  %v4882_v8 = vld [vmem:[#allocation21_spill] sm:$0xff] }
 0x4a2   : > { %v2150_v34 = vmul.f32 %v1911_v27, %v4453_v20  ;;  %v2152_v2 = vmul.f32 %v2072_v57, %v4455_v47  ;;  %2219 = vmatprep.subr.bf16.mxu1 %v2194_v3  ;;  %2259 = vmatprep.subr.bf16.mxu0 %v2196_v46  ;;  %v4881_v46 = vld [vmem:[#allocation20_spill] sm:$0xff]  ;;  %v4883_v57 = vld [vmem:[#allocation22_spill] sm:$0xff] }
 0x4a3   : > { %2220 = vmatpush1.bf16.xpose.msra.mxu1 %v2193_v14  ;;  %2260 = vmatpush1.bf16.xpose.msra.mxu0 %v2195_v1 }
 0x4a4   : > { %v1915_v54 = vpop.f32.mrb[88].mxu0  ;;  %v2076_v58 = vpop.f32.mrb[88].mxu1 }
 0x4a5   : > { %v2153_v26 = vmul.f32 %v1915_v54, %v4465_v48  ;;  %v2155_v35 = vmul.f32 %v2076_v58, %v4467_v41  ;;  %v1917_v21 = vpop.f32.mrb[89].mxu0  ;;  %v2078_v44 = vpop.f32.mrb[89].mxu1 }
 0x4a6   : > { %v2154_v19 = vmul.f32 %v1917_v21, %v4469_v22  ;;  %v2156_v39 = vmul.f32 %v2078_v44, %v4868_v63  ;;  %v4885_v63 = vld [vmem:[#allocation24_spill] sm:$0xff] }
 0x4a7   : > { %v2197_v12 = vpack.c.bf16 %v2153_v26, %v2149_v9  ;;  %v2199_v20 = vpack.c.bf16 %v2155_v35, %v2151_v49 }
 0x4a8   : > { %v2198_v15 = vpack.c.bf16 %v2154_v19, %v2150_v34  ;;  %v2200_v47 = vpack.c.bf16 %v2156_v39, %v2152_v2  ;;  %v1921_v23 = vpop.f32.mrb[90].mxu0  ;;  %v2082_v61 = vpop.f32.mrb[90].mxu1  ;;  %v4884_v2 = vld [vmem:[#allocation23_spill] sm:$0xff] }
 0x4a9   : > { %v2157_v7 = vmul.f32 %v1921_v23, %v4869_v24  ;;  %v2159_v31 = vmul.f32 %v2082_v61, %v4870_v56  ;;  %v1923_v25 = vpop.f32.mrb[91].mxu0  ;;  %v2084_v48 = vpop.f32.mrb[91].mxu1  ;;  %v4887_v23 = vld [vmem:[#allocation26_spill] sm:$0xff]  ;;  %v4888_v24 = vld [vmem:[#allocation27_spill] sm:$0xff] }
 0x4aa   : > { %v2158_v41 = vmul.f32 %v1923_v25, %v4871_v10  ;;  %v2160_v42 = vmul.f32 %v2084_v48, %v4872_v29  ;;  %2221 = vmatprep.subr.bf16.mxu1 %v2198_v15  ;;  %2261 = vmatprep.subr.bf16.mxu0 %v2200_v47  ;;  %v4889_v25 = vld [vmem:[#allocation28_spill] sm:$0xff]  ;;  %v4890_v10 = vld [vmem:[#allocation29_spill] sm:$0xff] }
 0x4ab   : > { %2222 = vmatpush1.bf16.xpose.msra.mxu1 %v2197_v12  ;;  %2262 = vmatpush1.bf16.xpose.msra.mxu0 %v2199_v20  ;;  %v4886_v12 = vld [vmem:[#allocation25_spill] sm:$0xff] }
 0x4ac   : > { %v1927_v22 = vpop.f32.mrb[92].mxu0  ;;  %v2088_v52 = vpop.f32.mrb[92].mxu1 }
 0x4ad   : > { %v2161_v37 = vmul.f32 %v1927_v22, %v4873_v38  ;;  %v2163_v51 = vmul.f32 %v2088_v52, %v4874_v59  ;;  %v1929_v45 = vpop.f32.mrb[93].mxu0  ;;  %v2090_v32 = vpop.f32.mrb[93].mxu1  ;;  %v4891_v22 = vld [vmem:[#allocation30_spill] sm:$0xff]  ;;  %v4892_v38 = vld [vmem:[#allocation31_spill] sm:$0xff] }
 0x4ae   : > { %v2162_v30 = vmul.f32 %v1929_v45, %v4875_v53  ;;  %v2164_v62 = vmul.f32 %v2090_v32, %v4876_v33  ;;  %v4893_v53 = vld [vmem:[#allocation5_spill] sm:$0xff]  ;;  %v4894_v33 = vld [vmem:[#allocation6_spill] sm:$0xff] }
 0x4af   : > { %v2201_v55 = vpack.c.bf16 %v2161_v37, %v2157_v7  ;;  %v2203_v5 = vpack.c.bf16 %v2163_v51, %v2159_v31 }
 0x4b0   : > { %v2202_v60 = vpack.c.bf16 %v2162_v30, %v2158_v41  ;;  %v2204_v4 = vpack.c.bf16 %v2164_v62, %v2160_v42  ;;  %v1933_v43 = vpop.f32.mrb[94].mxu0  ;;  %v2094_v13 = vpop.f32.mrb[94].mxu1  ;;  %v955_v30 = vpack.c.bf16 %v4893_v53, %v4893_v53  ;;  %v957_v62 = vpack.c.bf16 %v4894_v33, %v4894_v33 }
 0x4b1   : > { %v2165_v17 = vmul.f32 %v1933_v43, %v4877_v36  ;;  %v2167_v6 = vmul.f32 %v2094_v13, %v4878_v18  ;;  %v1935_v11 = vpop.f32.mrb[95].mxu0  ;;  %v2096_v40 = vpop.f32.mrb[95].mxu1 }
 0x4b2   : > { %v2166_v0 = vmul.f32 %v1935_v11, %v4879_v28  ;;  %v2168_v14 = vmul.f32 %v2096_v40, %v4880_v50  ;;  %2223 = vmatprep.subr.bf16.mxu1 %v2202_v60  ;;  %2263 = vmatprep.subr.bf16.mxu0 %v2204_v4 }
 0x4b3   : > { %2224 = vmatpush1.bf16.xpose.msra.mxu1 %v2201_v55  ;;  %2264 = vmatpush1.bf16.xpose.msra.mxu0 %v2203_v5 }
 0x4b4   : > { %v1939_v1 = vpop.f32.mrb[96].mxu0  ;;  %v2100_v3 = vpop.f32.mrb[96].mxu1 }
 0x4b5   : > { %v2169_v16 = vmul.f32 %v1939_v1, %v4881_v46  ;;  %v2171_v9 = vmul.f32 %v2100_v3, %v4882_v8  ;;  %v1941_v49 = vpop.f32.mrb[97].mxu0  ;;  %v2102_v27 = vpop.f32.mrb[97].mxu1 }
 0x4b6   : > { %v2170_v34 = vmul.f32 %v1941_v49, %v4883_v57  ;;  %v2172_v54 = vmul.f32 %v2102_v27, %v4884_v2 }
 0x4b7   : > { %v2205_v58 = vpack.c.bf16 %v2169_v16, %v2165_v17  ;;  %v2207_v26 = vpack.c.bf16 %v2171_v9, %v2167_v6 }
 0x4b8   : > { %v2206_v35 = vpack.c.bf16 %v2170_v34, %v2166_v0  ;;  %v2208_v21 = vpack.c.bf16 %v2172_v54, %v2168_v14  ;;  %v1945_v44 = vpop.f32.mrb[98].mxu0  ;;  %v2106_v19 = vpop.f32.mrb[98].mxu1 }
 0x4b9   : > { %v2173_v39 = vmul.f32 %v1945_v44, %v4885_v63  ;;  %v2175_v20 = vmul.f32 %v2106_v19, %v4886_v12  ;;  %v1947_v15 = vpop.f32.mrb[99].mxu0  ;;  %v2108_v47 = vpop.f32.mrb[99].mxu1 }
 0x4ba   : > { %v2174_v61 = vmul.f32 %v1947_v15, %v4887_v23  ;;  %v2176_v7 = vmul.f32 %v2108_v47, %v4888_v24  ;;  %2225 = vmatprep.subr.bf16.mxu1 %v2206_v35  ;;  %2265 = vmatprep.subr.bf16.mxu0 %v2208_v21 }
 0x4bb   : > { %2226 = vmatpush1.bf16.xpose.msra.mxu1 %v2205_v58  ;;  %2266 = vmatpush1.bf16.xpose.msra.mxu0 %v2207_v26 }
 0x4bc   : > { %v1951_v56 = vpop.f32.mrb[100].mxu0  ;;  %v2112_v31 = vpop.f32.mrb[100].mxu1 }
 0x4bd   : > { %v2177_v48 = vmul.f32 %v1951_v56, %v4889_v25  ;;  %v2179_v41 = vmul.f32 %v2112_v31, %v4890_v10  ;;  %v1953_v29 = vpop.f32.mrb[101].mxu0  ;;  %v2114_v42 = vpop.f32.mrb[101].mxu1 }
 0x4be   : > { %v2178_v52 = vmul.f32 %v1953_v29, %v4891_v22  ;;  %v2180_v37 = vmul.f32 %v2114_v42, %v4892_v38 }
 0x4bf   : > { %v2209_v59 = vpack.c.bf16 %v2177_v48, %v2173_v39  ;;  %v2211_v51 = vpack.c.bf16 %v2179_v41, %v2175_v20 }
 0x4c0   : > { %v2210_v45 = vpack.c.bf16 %v2178_v52, %v2174_v61  ;;  %v2212_v32 = vpack.c.bf16 %v2180_v37, %v2176_v7 }
 0x4c2   : > { %2227 = vmatprep.subr.bf16.mxu1 %v2210_v45  ;;  %2267 = vmatprep.subr.bf16.mxu0 %v2212_v32 }
 0x4c3   : > { %2228 = vmatpush1.bf16.xpose.msra.mxu1 %v2209_v59  ;;  %2268 = vmatpush1.bf16.xpose.msra.mxu0 %v2211_v51 }
 0x4ca   : > { %2246 = vmatmul.mubr.bf16.vlgmr.msra.gmra.mrb[104].mxu1 %v955_v30  ;;  %2286 = vmatmul.mubr.bf16.vlgmr.msra.gmra.mrb[104].mxu0 %v957_v62 }
 0x59d   : > { %v2247_v55 = vpop.f32.mrb[104].mxu1  ;;  %v2287_v5 = vpop.f32.mrb[104].mxu0 }
 0x59e   : > { %v2288_v60 = vadd.f32 %v2287_v5, %v2247_v55  ;;  %v2249_v4 = vpop.f32.mrb[105].mxu1  ;;  %v2289_v43 = vpop.f32.mrb[105].mxu0 }
 0x59f   : > { %v2250_v13 = vpop.f32.mrb[106].mxu1  ;;  %v2290_v36 = vpop.f32.mrb[106].mxu0 }
 0x5a0   : > { %vm2293_vm3 = vcmp.gt.f32.partialorder %v2288_v60, 0.0  ;;  %v2251_v17 = vpop.f32.mrb[107].mxu1  ;;  %v2291_v18 = vpop.f32.mrb[107].mxu0 }
 0x5a1   : > { %v2294_v6 = vsel %vm2293_vm3, %v2288_v60, 0.0 }
 0x5a2   : > { %2295 = vst [vmem:[%s225_s8] sm:$0xff] %v2294_v6 }
 0x5a3   : > { %3486 = shalt.err (!%p3483_p5)
}
 0x5a4   : > { %s3487_s24 = scalar_lea.hbm %s4760_s12, 128  ;;  %s3491_s30 = scalar_lea.hbm %s4811_s4, 256 }
 0x5a5   : > { %p3488_p6 = scmp.ne.s32.totalorder %s4760_s12, %s3487_s24  ;;  %p3492_p10 = scmp.lt.u32.totalorder %s4760_s12, %s4811_s4 }
 0x5a6   : > { %p3493_p11 = scmp.lt.u32.totalorder %s3491_s30, %s3487_s24  ;;  %p3495_p13 = scmp.lt.u32.totalorder %s3487_s24, %s4760_s12 }
 0x5a7   : > { %p3489_p7 = pnand %p3488_p6, %p3620_p4 }
 0x5a8   : > { %p3494_p12 = por %p3493_p11, %p3492_p10 }
 0x5a9   : > { %p3490_p9 = pneg %p3489_p7 }
 0x5aa   : > { %p3496_p0 = por %p3495_p13, %p3494_p12 }
 0x5ac   : > { %p3497_p1 = pnand %p3496_p0, %p3490_p9 }
 0x5ae   : > { %3500 = shalt.err (!%p3497_p1)
}
 0x5af   : > { %3383 = dma.vmem_to_hbm [thread:$0]  (%p3620_p4), %s4762_s9, 128, %s4760_s12, %s2297_s18  }
 0x5b0 PF: > { %p3389_p2 = scmp.ge.s32.totalorder %s3551_s20, 2  ;;  %s2323_s7 = sand.u32 1, %s3531_s15  }
 0x5b1   : > { %s2324_s8 = scalar_lea.sflag [#allocation3], %s2323_s7 }
 0x5b2   : > { %p3386_p3 = pnand %p3389_p2, %p3627_p8 }
 0x5b4   : > { %3526 = dma.done.wait (!%p3386_p3), %s2324_s8, 128  }
 0x5b5   : > { %3528 = vsyncadd (!%p3386_p3), %s2324_s8, 4294967168  ;;  %s17_s20 = sadd.s32 1, %s3551_s20   ;;  %s4895_s15 = smov %s3535_s16 }
 0x5b6   : > { %p14_p5 = scmp.ge.s32.totalorder %s17_s20, 4   ;;  %s4896_s16 = smov %s3539_s17 }
 0x5b7   : > { %s4897_s17 = smov %s3633_s28  ;;  %s4898_s18 = smov %s3547_s19 }
 0x5b8   : > { %s4899_s19 = smov %s4901_s23  ;;  %16 = sbr.rel (!%p14_p5) target bundleno = 4 (0x4), region = 74 }
 0x5bf   :  { %2329 = vsyncpa [#allocation3], 1 }
 0x5c0   :  { %2331 = vsyncpa [#allocation3 + $0x1], 1 }

</bundles_post_ra>
